<compile_context>
chip_gen: v5e
topology: v5e:2x2
jax: 0.10.0
libtpu: 0.0.40
codegen_flags: <defaults>
</compile_context>

<pallas_src>
import jax
import jax.numpy as jnp
from jax import lax
from jax.experimental import pallas as pl
from jax.experimental.pallas import tpu as pltpu

# ----------------------------- configuration -----------------------------
EMBED_DIM = 32
HIDDEN_DIM = 32
HIDDEN2_DIM = 32
OUT_SIZE = 16      # every entry of output_size_dic -> 16 (uniform, stackable)
NUM_KEYS = 2       # number of "WORD/POS" keys in output_size_dic
VOCAB = 20
BATCH = 2
SEQ = 8
PAD_IDX = 1


# ----------------------------- fused kernel -----------------------------
def _bilstm_layer(x_flat, wih, whh, bias, T, B, H):
    """One bidirectional LSTM layer with fwd+bwd directions fused.

    x_flat: (T*B, Din)  time-major-flattened layer input (row = t*B + b)
    wih:    (Din, 8H)   [fwd | bwd] input->gate weights (pre-transposed)
    whh:    (H,   8H)   [fwd | bwd] hidden->gate weights (pre-transposed)
    bias:   (1,   8H)   [fwd | bwd] combined b_ih + b_hh
    Returns (T*B, 2H)   row t*B+b = [h_fwd(t, b) | h_bwd(t, b)]
    """
    H4 = 4 * H
    # Hoisted non-recurrent input projection: one wide MXU matmul instead of
    # 2*T tiny ones on the serial critical path.  Bias folded in here.
    xpre = jnp.dot(x_flat, wih, preferred_element_type=jnp.float32) + bias  # (T*B, 8H)

    # Both directions stacked along sublanes: rows 0:B fwd state, B:2B bwd state.
    h = jnp.zeros((2 * B, H), jnp.float32)   # init_hidden(): zeros
    c = jnp.zeros((2 * B, H), jnp.float32)
    h_fwd = [None] * T
    h_bwd = [None] * T
    for t in range(T):           # static unroll; T is small and fixed
        tb = T - 1 - t           # bwd direction walks the sequence in reverse
        # single (2B, H) @ (H, 8H) recurrent matmul per step (256-lane wide)
        hh = jnp.dot(h, whh, preferred_element_type=jnp.float32)        # (2B, 8H)
        g_f = xpre[t * B:(t + 1) * B, 0:H4] + hh[0:B, 0:H4]
        g_b = xpre[tb * B:(tb + 1) * B, H4:2 * H4] + hh[B:2 * B, H4:2 * H4]
        gates = jnp.concatenate([g_f, g_b], axis=0)                      # (2B, 4H)
        i = jax.nn.sigmoid(gates[:, 0 * H:1 * H])    # PyTorch gate order i,f,g,o
        f = jax.nn.sigmoid(gates[:, 1 * H:2 * H])
        g = jnp.tanh(gates[:, 2 * H:3 * H])
        o = jax.nn.sigmoid(gates[:, 3 * H:4 * H])
        c = f * c + i * g
        h = o * jnp.tanh(c)
        h_fwd[t] = h[0:B]         # fwd hidden belongs to time t
        h_bwd[tb] = h[B:2 * B]    # bwd hidden belongs to time tb
    rows = [jnp.concatenate([h_fwd[t], h_bwd[t]], axis=1) for t in range(T)]
    return jnp.concatenate(rows, axis=0)                                  # (T*B, 2H)


def _fused_forward_kernel(tgt_ref, key_ref, x_ref,
                          wih0_ref, whh0_ref, b0_ref,
                          wih1_ref, whh1_ref, b1_ref,
                          w2_ref, b2_ref, fcw_ref, fcb_ref,
                          out_ref, seq_ref):
    """Entire MyLSTM forward in one kernel.

    tgt_ref, key_ref: SMEM (B,) int32 — target position / fc-layer key per batch elt
    x_ref:            (T*B, E) embedded input, time-major flattened (row t*B + b)
    wih*/whh*/b*:     fused per-layer LSTM weights (see _bilstm_layer)
    w2_ref, b2_ref:   (2H, H2), (1, H2) hidden2 Linear
    fcw_ref, fcb_ref: (K, H2, OUT), (K, 1, OUT) stacked per-key output layers
    out_ref:          (B, OUT) result rows
    seq_ref:          (T*B, 2H) VMEM scratch holding the final Bi-LSTM sequence
    """
    B = out_ref.shape[0]
    T = x_ref.shape[0] // B
    H = whh0_ref.shape[0]

    # ---- 2-layer bidirectional LSTM (fwd+bwd fused per layer) ----
    seq0 = _bilstm_layer(x_ref[...], wih0_ref[...], whh0_ref[...], b0_ref[...], T, B, H)
    seq1 = _bilstm_layer(seq0, wih1_ref[...], whh1_ref[...], b1_ref[...], T, B, H)
    seq_ref[...] = seq1   # park in VMEM scratch so target rows can be picked dynamically

    # ---- hidden2 (Linear + ReLU) and per-key fc, on the B target rows only ----
    # (ReLU/fc commute with row selection; Dropout is identity at inference.)
    w2 = w2_ref[...]
    b2 = b2_ref[...]
    outs = []
    for b in range(B):    # B is tiny and static
        # NOTE: like torch indexing, tgt is assumed in-range (no runtime OOB check).
        row = seq_ref[pl.ds(tgt_ref[b] * B + b, 1), :]                        # (1, 2H)
        hid2 = jnp.maximum(
            jnp.dot(row, w2, preferred_element_type=jnp.float32) + b2, 0.0)   # (1, H2)
        k = key_ref[b]
        logits = (jnp.dot(hid2, fcw_ref[k], preferred_element_type=jnp.float32)
                  + fcb_ref[k])                                                # (1, OUT)
        outs.append(logits)
    out_ref[...] = jnp.concatenate(outs, axis=0)


# ----------------------------- forward wrapper -----------------------------
@jax.jit
def my_lstm_forward(params, batch_tokens, target_index_list, target_key_idx):
    """batch_tokens: (B, T) int32; returns (B, OUT_SIZE) float32
    (row b == result[b] of the PyTorch forward's returned list)."""
    B, T = batch_tokens.shape
    # frozen embedding lookup, gathered directly in time-major flat order (row t*B + b)
    x_flat = jnp.take(params["emb"], batch_tokens.T.reshape(-1), axis=0)   # (T*B, E)

    smem = pl.BlockSpec(memory_space=pltpu.MemorySpace.SMEM)
    vmem = pl.BlockSpec(memory_space=pltpu.MemorySpace.VMEM)
    return pl.pallas_call(
        _fused_forward_kernel,
        out_shape=jax.ShapeDtypeStruct((B, OUT_SIZE), jnp.float32),
        in_specs=[smem, smem] + [vmem] * 11,
        out_specs=vmem,
        scratch_shapes=[pltpu.VMEM((T * B, 2 * HIDDEN_DIM), jnp.float32)],
    )(target_index_list.astype(jnp.int32), target_key_idx.astype(jnp.int32), x_flat,
      params["wih0"], params["whh0"], params["b0"],
      params["wih1"], params["whh1"], params["b1"],
      params["w2"], params["b2"], params["fc_w"], params["fc_b"])


# ----------------------------- parameter init -----------------------------
def init_params(key):
    keys = iter(jax.random.split(key, 64))
    params = {}
    raw = {}   # untransformed weights, used by the pure-JAX reference

    # frozen embedding (stands in for the glove matrix); padding row = 0
    emb = jax.random.normal(next(keys), (VOCAB, EMBED_DIM), jnp.float32) * 0.1
    emb = emb.at[PAD_IDX].set(0.0)
    params["emb"] = emb

    H = HIDDEN_DIM
    k = 1.0 / (H ** 0.5)

    def lstm_dir_raw(din):
        w_ih = jax.random.uniform(next(keys), (4 * H, din), jnp.float32, -k, k)
        w_hh = jax.random.uniform(next(keys), (4 * H, H), jnp.float32, -k, k)
        b_ih = jax.random.uniform(next(keys), (4 * H,), jnp.float32, -k, k)
        b_hh = jax.random.uniform(next(keys), (4 * H,), jnp.float32, -k, k)
        return (w_ih, w_hh, b_ih, b_hh)

    raw["lstm"] = []
    for layer in range(2):
        din = EMBED_DIM if layer == 0 else 2 * H
        fwd = lstm_dir_raw(din)
        bwd = lstm_dir_raw(din)
        raw["lstm"].append({"fwd": fwd, "bwd": bwd})
        # fuse directions: [fwd | bwd] along the gate axis; pre-transpose; combine biases
        params[f"wih{layer}"] = jnp.concatenate([fwd[0].T, bwd[0].T], axis=1)   # (Din, 8H)
        params[f"whh{layer}"] = jnp.concatenate([fwd[1].T, bwd[1].T], axis=1)   # (H, 8H)
        params[f"b{layer}"] = jnp.concatenate(
            [fwd[2] + fwd[3], bwd[2] + bwd[3]]).reshape(1, 8 * H)               # (1, 8H)

    # hidden2 Linear(2H -> H2)
    kin = 1.0 / ((2 * H) ** 0.5)
    w2 = jax.random.uniform(next(keys), (HIDDEN2_DIM, 2 * H), jnp.float32, -kin, kin)
    b2 = jax.random.uniform(next(keys), (HIDDEN2_DIM,), jnp.float32, -kin, kin)
    raw["w2"], raw["b2"] = w2, b2
    params["w2"] = w2.T                       # (2H, H2)
    params["b2"] = b2.reshape(1, HIDDEN2_DIM)

    # per-key output layers Linear(H2 -> OUT), stacked along the key axis
    kfc = 1.0 / (HIDDEN2_DIM ** 0.5)
    fcw = jax.random.uniform(next(keys), (NUM_KEYS, OUT_SIZE, HIDDEN2_DIM),
                             jnp.float32, -kfc, kfc)
    fcb = jax.random.uniform(next(keys), (NUM_KEYS, OUT_SIZE), jnp.float32, -kfc, kfc)
    raw["fc_w"], raw["fc_b"] = fcw, fcb
    params["fc_w"] = jnp.transpose(fcw, (0, 2, 1))       # (K, H2, OUT)
    params["fc_b"] = fcb.reshape(NUM_KEYS, 1, OUT_SIZE)  # (K, 1, OUT)
    return params, raw


# ----------------------------- pure-JAX reference -----------------------------
def _ref_lstm_direction(x_tbd, w_ih, w_hh, b_ih, b_hh):
    T, B, _ = x_tbd.shape
    H = w_hh.shape[1]

    def step(carry, x_t):
        h, c = carry
        gates = x_t @ w_ih.T + h @ w_hh.T + b_ih + b_hh
        i = jax.nn.sigmoid(gates[:, 0 * H:1 * H])
        f = jax.nn.sigmoid(gates[:, 1 * H:2 * H])
        g = jnp.tanh(gates[:, 2 * H:3 * H])
        o = jax.nn.sigmoid(gates[:, 3 * H:4 * H])
        c = f * c + i * g
        h = o * jnp.tanh(c)
        return (h, c), h

    init = (jnp.zeros((B, H), jnp.float32), jnp.zeros((B, H), jnp.float32))
    _, hs = lax.scan(step, init, x_tbd)
    return hs   # (T, B, H)


def reference_forward(params, raw, batch_tokens, target_index_list, target_key_idx):
    embeds = jnp.take(params["emb"], batch_tokens, axis=0)        # (B, T, E)
    x = jnp.transpose(embeds, (1, 0, 2))                          # (T, B, E)
    for layer in raw["lstm"]:
        fwd = _ref_lstm_direction(x, *layer["fwd"])
        bwd = _ref_lstm_direction(x[::-1], *layer["bwd"])[::-1]
        x = jnp.concatenate([fwd, bwd], axis=-1)
    bi = jnp.transpose(x, (1, 0, 2))                              # (B, T, 2H)
    h2 = jnp.maximum(jnp.einsum("btd,hd->bth", bi, raw["w2"]) + raw["b2"], 0.0)
    outs = []
    for b in range(batch_tokens.shape[0]):
        k = int(target_key_idx[b])
        t = int(target_index_list[b])
        outs.append(h2[b, t] @ raw["fc_w"][k].T + raw["fc_b"][k])
    return jnp.stack(outs)                                        # (B, OUT)


# ----------------------------- main -----------------------------
if __name__ == "__main__":
    root = jax.random.PRNGKey(0)
    p_key, d_key = jax.random.split(root)

    params, raw = init_params(p_key)

    # deterministic example inputs
    batch_tokens = jax.random.randint(d_key, (BATCH, SEQ), 0, VOCAB, dtype=jnp.int32)
    target_index_list = jnp.array([3, 5], dtype=jnp.int32)   # target word position per sentence
    target_key_idx = jnp.array([0, 1], dtype=jnp.int32)      # which "WORD/POS" fc layer per sentence

    out = my_lstm_forward(params, batch_tokens, target_index_list, target_key_idx)
    out = jax.block_until_ready(out)
    assert out.shape == (BATCH, OUT_SIZE) and out.dtype == jnp.float32

    # correctness check against a plain-JAX reference built from the raw weights
    ref = reference_forward(params, raw, batch_tokens, target_index_list, target_key_idx)
    max_err = float(jnp.max(jnp.abs(out - ref)))
    assert max_err < 2e-3, f"kernel/reference mismatch: max abs err = {max_err}"

    print("KERNEL_OK")
</pallas_src>

<mosaic_0001>
module attributes {stable_mosaic.version = 11 : i64} {
  func.func @_fused_forward_kernel(%arg0: memref<2xi32, #tpu.memory_space<smem>>, %arg1: memref<2xi32, #tpu.memory_space<smem>>, %arg2: memref<16x32xf32, #tpu.memory_space<vmem>>, %arg3: memref<32x256xf32, #tpu.memory_space<vmem>>, %arg4: memref<32x256xf32, #tpu.memory_space<vmem>>, %arg5: memref<1x256xf32, #tpu.memory_space<vmem>>, %arg6: memref<64x256xf32, #tpu.memory_space<vmem>>, %arg7: memref<32x256xf32, #tpu.memory_space<vmem>>, %arg8: memref<1x256xf32, #tpu.memory_space<vmem>>, %arg9: memref<64x32xf32, #tpu.memory_space<vmem>>, %arg10: memref<1x32xf32, #tpu.memory_space<vmem>>, %arg11: memref<2x32x16xf32, #tpu.memory_space<vmem>>, %arg12: memref<2x1x16xf32, #tpu.memory_space<vmem>>, %arg13: memref<2x16xf32, #tpu.memory_space<vmem>>, %arg14: memref<16x64xf32, #tpu.memory_space<vmem>>) attributes {dimension_semantics = [], scalar_prefetch = 0 : i64, scratch_operands = 1 : i64, tpu.core_type = #tpu.core_type<tc>} {
    %c0 = arith.constant 0 : index
    %c0_0 = arith.constant 0 : index
    %0 = vector.load %arg2[%c0, %c0_0] : memref<16x32xf32, #tpu.memory_space<vmem>>, vector<16x32xf32>
    %c0_1 = arith.constant 0 : index
    %c0_2 = arith.constant 0 : index
    %1 = vector.load %arg3[%c0_1, %c0_2] : memref<32x256xf32, #tpu.memory_space<vmem>>, vector<32x256xf32>
    %c0_3 = arith.constant 0 : index
    %c0_4 = arith.constant 0 : index
    %2 = vector.load %arg4[%c0_3, %c0_4] : memref<32x256xf32, #tpu.memory_space<vmem>>, vector<32x256xf32>
    %c0_5 = arith.constant 0 : index
    %c0_6 = arith.constant 0 : index
    %3 = vector.load %arg5[%c0_5, %c0_6] : memref<1x256xf32, #tpu.memory_space<vmem>>, vector<1x256xf32>
    %cst = arith.constant dense<0.000000e+00> : vector<16x256xf32>
    %4 = tpu.matmul %0, %1, %cst {dimension_numbers = #tpu.dot_dimension_numbers<[1], [0], [0], [1], [0, 0, 1, 1], [], []>} : vector<16x32xf32>, vector<32x256xf32>, vector<16x256xf32> -> vector<16x256xf32>
    %5 = vector.broadcast %3 : vector<1x256xf32> to vector<16x256xf32>
    %6 = arith.addf %4, %5 : vector<16x256xf32>
    %cst_7 = arith.constant 0.000000e+00 : f32
    %7 = vector.broadcast %cst_7 : f32 to vector<4x32xf32>
    %cst_8 = arith.constant 0.000000e+00 : f32
    %8 = vector.broadcast %cst_8 : f32 to vector<4x32xf32>
    %cst_9 = arith.constant dense<0.000000e+00> : vector<4x256xf32>
    %9 = tpu.matmul %7, %2, %cst_9 {dimension_numbers = #tpu.dot_dimension_numbers<[1], [0], [0], [1], [0, 0, 1, 1], [], []>} : vector<4x32xf32>, vector<32x256xf32>, vector<4x256xf32> -> vector<4x256xf32>
    %10 = vector.extract_strided_slice %6 {offsets = [0, 0], sizes = [2, 128], strides = [1, 1]} : vector<16x256xf32> to vector<2x128xf32>
    %11 = vector.extract_strided_slice %9 {offsets = [0, 0], sizes = [2, 128], strides = [1, 1]} : vector<4x256xf32> to vector<2x128xf32>
    %12 = arith.addf %10, %11 : vector<2x128xf32>
    %13 = vector.extract_strided_slice %6 {offsets = [14, 128], sizes = [2, 128], strides = [1, 1]} : vector<16x256xf32> to vector<2x128xf32>
    %14 = vector.extract_strided_slice %9 {offsets = [2, 128], sizes = [2, 128], strides = [1, 1]} : vector<4x256xf32> to vector<2x128xf32>
    %15 = arith.addf %13, %14 : vector<2x128xf32>
    %16 = tpu.concatenate %12, %15 in 0 : vector<2x128xf32>, vector<2x128xf32> -> vector<4x128xf32>
    %17 = vector.extract_strided_slice %16 {offsets = [0, 0], sizes = [4, 32], strides = [1, 1]} : vector<4x128xf32> to vector<4x32xf32>
    %18 = arith.negf %17 : vector<4x32xf32>
    %19 = math.exp %18 : vector<4x32xf32>
    %cst_10 = arith.constant 1.000000e+00 : f32
    %20 = vector.broadcast %cst_10 : f32 to vector<4x32xf32>
    %21 = arith.addf %20, %19 : vector<4x32xf32>
    %22 = arith.divf %20, %21 : vector<4x32xf32>
    %23 = vector.extract_strided_slice %16 {offsets = [0, 32], sizes = [4, 32], strides = [1, 1]} : vector<4x128xf32> to vector<4x32xf32>
    %24 = arith.negf %23 : vector<4x32xf32>
    %25 = math.exp %24 : vector<4x32xf32>
    %cst_11 = arith.constant 1.000000e+00 : f32
    %26 = vector.broadcast %cst_11 : f32 to vector<4x32xf32>
    %27 = arith.addf %26, %25 : vector<4x32xf32>
    %28 = arith.divf %26, %27 : vector<4x32xf32>
    %29 = vector.extract_strided_slice %16 {offsets = [0, 64], sizes = [4, 32], strides = [1, 1]} : vector<4x128xf32> to vector<4x32xf32>
    %30 = math.tanh %29 : vector<4x32xf32>
    %31 = vector.extract_strided_slice %16 {offsets = [0, 96], sizes = [4, 32], strides = [1, 1]} : vector<4x128xf32> to vector<4x32xf32>
    %32 = arith.negf %31 : vector<4x32xf32>
    %33 = math.exp %32 : vector<4x32xf32>
    %cst_12 = arith.constant 1.000000e+00 : f32
    %34 = vector.broadcast %cst_12 : f32 to vector<4x32xf32>
    %35 = arith.addf %34, %33 : vector<4x32xf32>
    %36 = arith.divf %34, %35 : vector<4x32xf32>
    %37 = arith.mulf %28, %8 : vector<4x32xf32>
    %38 = arith.mulf %22, %30 : vector<4x32xf32>
    %39 = arith.addf %37, %38 : vector<4x32xf32>
    %40 = math.tanh %39 : vector<4x32xf32>
    %41 = arith.mulf %36, %40 : vector<4x32xf32>
    %42 = vector.extract_strided_slice %41 {offsets = [0, 0], sizes = [2, 32], strides = [1, 1]} : vector<4x32xf32> to vector<2x32xf32>
    %43 = vector.extract_strided_slice %41 {offsets = [2, 0], sizes = [2, 32], strides = [1, 1]} : vector<4x32xf32> to vector<2x32xf32>
    %cst_13 = arith.constant dense<0.000000e+00> : vector<4x256xf32>
    %44 = tpu.matmul %41, %2, %cst_13 {dimension_numbers = #tpu.dot_dimension_numbers<[1], [0], [0], [1], [0, 0, 1, 1], [], []>} : vector<4x32xf32>, vector<32x256xf32>, vector<4x256xf32> -> vector<4x256xf32>
    %45 = vector.extract_strided_slice %6 {offsets = [2, 0], sizes = [2, 128], strides = [1, 1]} : vector<16x256xf32> to vector<2x128xf32>
    %46 = vector.extract_strided_slice %44 {offsets = [0, 0], sizes = [2, 128], strides = [1, 1]} : vector<4x256xf32> to vector<2x128xf32>
    %47 = arith.addf %45, %46 : vector<2x128xf32>
    %48 = vector.extract_strided_slice %6 {offsets = [12, 128], sizes = [2, 128], strides = [1, 1]} : vector<16x256xf32> to vector<2x128xf32>
    %49 = vector.extract_strided_slice %44 {offsets = [2, 128], sizes = [2, 128], strides = [1, 1]} : vector<4x256xf32> to vector<2x128xf32>
    %50 = arith.addf %48, %49 : vector<2x128xf32>
    %51 = tpu.concatenate %47, %50 in 0 : vector<2x128xf32>, vector<2x128xf32> -> vector<4x128xf32>
    %52 = vector.extract_strided_slice %51 {offsets = [0, 0], sizes = [4, 32], strides = [1, 1]} : vector<4x128xf32> to vector<4x32xf32>
    %53 = arith.negf %52 : vector<4x32xf32>
    %54 = math.exp %53 : vector<4x32xf32>
    %cst_14 = arith.constant 1.000000e+00 : f32
    %55 = vector.broadcast %cst_14 : f32 to vector<4x32xf32>
    %56 = arith.addf %55, %54 : vector<4x32xf32>
    %57 = arith.divf %55, %56 : vector<4x32xf32>
    %58 = vector.extract_strided_slice %51 {offsets = [0, 32], sizes = [4, 32], strides = [1, 1]} : vector<4x128xf32> to vector<4x32xf32>
    %59 = arith.negf %58 : vector<4x32xf32>
    %60 = math.exp %59 : vector<4x32xf32>
    %cst_15 = arith.constant 1.000000e+00 : f32
    %61 = vector.broadcast %cst_15 : f32 to vector<4x32xf32>
    %62 = arith.addf %61, %60 : vector<4x32xf32>
    %63 = arith.divf %61, %62 : vector<4x32xf32>
    %64 = vector.extract_strided_slice %51 {offsets = [0, 64], sizes = [4, 32], strides = [1, 1]} : vector<4x128xf32> to vector<4x32xf32>
    %65 = math.tanh %64 : vector<4x32xf32>
    %66 = vector.extract_strided_slice %51 {offsets = [0, 96], sizes = [4, 32], strides = [1, 1]} : vector<4x128xf32> to vector<4x32xf32>
    %67 = arith.negf %66 : vector<4x32xf32>
    %68 = math.exp %67 : vector<4x32xf32>
    %cst_16 = arith.constant 1.000000e+00 : f32
    %69 = vector.broadcast %cst_16 : f32 to vector<4x32xf32>
    %70 = arith.addf %69, %68 : vector<4x32xf32>
    %71 = arith.divf %69, %70 : vector<4x32xf32>
    %72 = arith.mulf %63, %39 : vector<4x32xf32>
    %73 = arith.mulf %57, %65 : vector<4x32xf32>
    %74 = arith.addf %72, %73 : vector<4x32xf32>
    %75 = math.tanh %74 : vector<4x32xf32>
    %76 = arith.mulf %71, %75 : vector<4x32xf32>
    %77 = vector.extract_strided_slice %76 {offsets = [0, 0], sizes = [2, 32], strides = [1, 1]} : vector<4x32xf32> to vector<2x32xf32>
    %78 = vector.extract_strided_slice %76 {offsets = [2, 0], sizes = [2, 32], strides = [1, 1]} : vector<4x32xf32> to vector<2x32xf32>
    %cst_17 = arith.constant dense<0.000000e+00> : vector<4x256xf32>
    %79 = tpu.matmul %76, %2, %cst_17 {dimension_numbers = #tpu.dot_dimension_numbers<[1], [0], [0], [1], [0, 0, 1, 1], [], []>} : vector<4x32xf32>, vector<32x256xf32>, vector<4x256xf32> -> vector<4x256xf32>
    %80 = vector.extract_strided_slice %6 {offsets = [4, 0], sizes = [2, 128], strides = [1, 1]} : vector<16x256xf32> to vector<2x128xf32>
    %81 = vector.extract_strided_slice %79 {offsets = [0, 0], sizes = [2, 128], strides = [1, 1]} : vector<4x256xf32> to vector<2x128xf32>
    %82 = arith.addf %80, %81 : vector<2x128xf32>
    %83 = vector.extract_strided_slice %6 {offsets = [10, 128], sizes = [2, 128], strides = [1, 1]} : vector<16x256xf32> to vector<2x128xf32>
    %84 = vector.extract_strided_slice %79 {offsets = [2, 128], sizes = [2, 128], strides = [1, 1]} : vector<4x256xf32> to vector<2x128xf32>
    %85 = arith.addf %83, %84 : vector<2x128xf32>
    %86 = tpu.concatenate %82, %85 in 0 : vector<2x128xf32>, vector<2x128xf32> -> vector<4x128xf32>
    %87 = vector.extract_strided_slice %86 {offsets = [0, 0], sizes = [4, 32], strides = [1, 1]} : vector<4x128xf32> to vector<4x32xf32>
    %88 = arith.negf %87 : vector<4x32xf32>
    %89 = math.exp %88 : vector<4x32xf32>
    %cst_18 = arith.constant 1.000000e+00 : f32
    %90 = vector.broadcast %cst_18 : f32 to vector<4x32xf32>
    %91 = arith.addf %90, %89 : vector<4x32xf32>
    %92 = arith.divf %90, %91 : vector<4x32xf32>
    %93 = vector.extract_strided_slice %86 {offsets = [0, 32], sizes = [4, 32], strides = [1, 1]} : vector<4x128xf32> to vector<4x32xf32>
    %94 = arith.negf %93 : vector<4x32xf32>
    %95 = math.exp %94 : vector<4x32xf32>
    %cst_19 = arith.constant 1.000000e+00 : f32
    %96 = vector.broadcast %cst_19 : f32 to vector<4x32xf32>
    %97 = arith.addf %96, %95 : vector<4x32xf32>
    %98 = arith.divf %96, %97 : vector<4x32xf32>
    %99 = vector.extract_strided_slice %86 {offsets = [0, 64], sizes = [4, 32], strides = [1, 1]} : vector<4x128xf32> to vector<4x32xf32>
    %100 = math.tanh %99 : vector<4x32xf32>
    %101 = vector.extract_strided_slice %86 {offsets = [0, 96], sizes = [4, 32], strides = [1, 1]} : vector<4x128xf32> to vector<4x32xf32>
    %102 = arith.negf %101 : vector<4x32xf32>
    %103 = math.exp %102 : vector<4x32xf32>
    %cst_20 = arith.constant 1.000000e+00 : f32
    %104 = vector.broadcast %cst_20 : f32 to vector<4x32xf32>
    %105 = arith.addf %104, %103 : vector<4x32xf32>
    %106 = arith.divf %104, %105 : vector<4x32xf32>
    %107 = arith.mulf %98, %74 : vector<4x32xf32>
    %108 = arith.mulf %92, %100 : vector<4x32xf32>
    %109 = arith.addf %107, %108 : vector<4x32xf32>
    %110 = math.tanh %109 : vector<4x32xf32>
    %111 = arith.mulf %106, %110 : vector<4x32xf32>
    %112 = vector.extract_strided_slice %111 {offsets = [0, 0], sizes = [2, 32], strides = [1, 1]} : vector<4x32xf32> to vector<2x32xf32>
    %113 = vector.extract_strided_slice %111 {offsets = [2, 0], sizes = [2, 32], strides = [1, 1]} : vector<4x32xf32> to vector<2x32xf32>
    %cst_21 = arith.constant dense<0.000000e+00> : vector<4x256xf32>
    %114 = tpu.matmul %111, %2, %cst_21 {dimension_numbers = #tpu.dot_dimension_numbers<[1], [0], [0], [1], [0, 0, 1, 1], [], []>} : vector<4x32xf32>, vector<32x256xf32>, vector<4x256xf32> -> vector<4x256xf32>
    %115 = vector.extract_strided_slice %6 {offsets = [6, 0], sizes = [2, 128], strides = [1, 1]} : vector<16x256xf32> to vector<2x128xf32>
    %116 = vector.extract_strided_slice %114 {offsets = [0, 0], sizes = [2, 128], strides = [1, 1]} : vector<4x256xf32> to vector<2x128xf32>
    %117 = arith.addf %115, %116 : vector<2x128xf32>
    %118 = vector.extract_strided_slice %6 {offsets = [8, 128], sizes = [2, 128], strides = [1, 1]} : vector<16x256xf32> to vector<2x128xf32>
    %119 = vector.extract_strided_slice %114 {offsets = [2, 128], sizes = [2, 128], strides = [1, 1]} : vector<4x256xf32> to vector<2x128xf32>
    %120 = arith.addf %118, %119 : vector<2x128xf32>
    %121 = tpu.concatenate %117, %120 in 0 : vector<2x128xf32>, vector<2x128xf32> -> vector<4x128xf32>
    %122 = vector.extract_strided_slice %121 {offsets = [0, 0], sizes = [4, 32], strides = [1, 1]} : vector<4x128xf32> to vector<4x32xf32>
    %123 = arith.negf %122 : vector<4x32xf32>
    %124 = math.exp %123 : vector<4x32xf32>
    %cst_22 = arith.constant 1.000000e+00 : f32
    %125 = vector.broadcast %cst_22 : f32 to vector<4x32xf32>
    %126 = arith.addf %125, %124 : vector<4x32xf32>
    %127 = arith.divf %125, %126 : vector<4x32xf32>
    %128 = vector.extract_strided_slice %121 {offsets = [0, 32], sizes = [4, 32], strides = [1, 1]} : vector<4x128xf32> to vector<4x32xf32>
    %129 = arith.negf %128 : vector<4x32xf32>
    %130 = math.exp %129 : vector<4x32xf32>
    %cst_23 = arith.constant 1.000000e+00 : f32
    %131 = vector.broadcast %cst_23 : f32 to vector<4x32xf32>
    %132 = arith.addf %131, %130 : vector<4x32xf32>
    %133 = arith.divf %131, %132 : vector<4x32xf32>
    %134 = vector.extract_strided_slice %121 {offsets = [0, 64], sizes = [4, 32], strides = [1, 1]} : vector<4x128xf32> to vector<4x32xf32>
    %135 = math.tanh %134 : vector<4x32xf32>
    %136 = vector.extract_strided_slice %121 {offsets = [0, 96], sizes = [4, 32], strides = [1, 1]} : vector<4x128xf32> to vector<4x32xf32>
    %137 = arith.negf %136 : vector<4x32xf32>
    %138 = math.exp %137 : vector<4x32xf32>
    %cst_24 = arith.constant 1.000000e+00 : f32
    %139 = vector.broadcast %cst_24 : f32 to vector<4x32xf32>
    %140 = arith.addf %139, %138 : vector<4x32xf32>
    %141 = arith.divf %139, %140 : vector<4x32xf32>
    %142 = arith.mulf %133, %109 : vector<4x32xf32>
    %143 = arith.mulf %127, %135 : vector<4x32xf32>
    %144 = arith.addf %142, %143 : vector<4x32xf32>
    %145 = math.tanh %144 : vector<4x32xf32>
    %146 = arith.mulf %141, %145 : vector<4x32xf32>
    %147 = vector.extract_strided_slice %146 {offsets = [0, 0], sizes = [2, 32], strides = [1, 1]} : vector<4x32xf32> to vector<2x32xf32>
    %148 = vector.extract_strided_slice %146 {offsets = [2, 0], sizes = [2, 32], strides = [1, 1]} : vector<4x32xf32> to vector<2x32xf32>
    %cst_25 = arith.constant dense<0.000000e+00> : vector<4x256xf32>
    %149 = tpu.matmul %146, %2, %cst_25 {dimension_numbers = #tpu.dot_dimension_numbers<[1], [0], [0], [1], [0, 0, 1, 1], [], []>} : vector<4x32xf32>, vector<32x256xf32>, vector<4x256xf32> -> vector<4x256xf32>
    %150 = vector.extract_strided_slice %6 {offsets = [8, 0], sizes = [2, 128], strides = [1, 1]} : vector<16x256xf32> to vector<2x128xf32>
    %151 = vector.extract_strided_slice %149 {offsets = [0, 0], sizes = [2, 128], strides = [1, 1]} : vector<4x256xf32> to vector<2x128xf32>
    %152 = arith.addf %150, %151 : vector<2x128xf32>
    %153 = vector.extract_strided_slice %6 {offsets = [6, 128], sizes = [2, 128], strides = [1, 1]} : vector<16x256xf32> to vector<2x128xf32>
    %154 = vector.extract_strided_slice %149 {offsets = [2, 128], sizes = [2, 128], strides = [1, 1]} : vector<4x256xf32> to vector<2x128xf32>
    %155 = arith.addf %153, %154 : vector<2x128xf32>
    %156 = tpu.concatenate %152, %155 in 0 : vector<2x128xf32>, vector<2x128xf32> -> vector<4x128xf32>
    %157 = vector.extract_strided_slice %156 {offsets = [0, 0], sizes = [4, 32], strides = [1, 1]} : vector<4x128xf32> to vector<4x32xf32>
    %158 = arith.negf %157 : vector<4x32xf32>
    %159 = math.exp %158 : vector<4x32xf32>
    %cst_26 = arith.constant 1.000000e+00 : f32
    %160 = vector.broadcast %cst_26 : f32 to vector<4x32xf32>
    %161 = arith.addf %160, %159 : vector<4x32xf32>
    %162 = arith.divf %160, %161 : vector<4x32xf32>
    %163 = vector.extract_strided_slice %156 {offsets = [0, 32], sizes = [4, 32], strides = [1, 1]} : vector<4x128xf32> to vector<4x32xf32>
    %164 = arith.negf %163 : vector<4x32xf32>
    %165 = math.exp %164 : vector<4x32xf32>
    %cst_27 = arith.constant 1.000000e+00 : f32
    %166 = vector.broadcast %cst_27 : f32 to vector<4x32xf32>
    %167 = arith.addf %166, %165 : vector<4x32xf32>
    %168 = arith.divf %166, %167 : vector<4x32xf32>
    %169 = vector.extract_strided_slice %156 {offsets = [0, 64], sizes = [4, 32], strides = [1, 1]} : vector<4x128xf32> to vector<4x32xf32>
    %170 = math.tanh %169 : vector<4x32xf32>
    %171 = vector.extract_strided_slice %156 {offsets = [0, 96], sizes = [4, 32], strides = [1, 1]} : vector<4x128xf32> to vector<4x32xf32>
    %172 = arith.negf %171 : vector<4x32xf32>
    %173 = math.exp %172 : vector<4x32xf32>
    %cst_28 = arith.constant 1.000000e+00 : f32
    %174 = vector.broadcast %cst_28 : f32 to vector<4x32xf32>
    %175 = arith.addf %174, %173 : vector<4x32xf32>
    %176 = arith.divf %174, %175 : vector<4x32xf32>
    %177 = arith.mulf %168, %144 : vector<4x32xf32>
    %178 = arith.mulf %162, %170 : vector<4x32xf32>
    %179 = arith.addf %177, %178 : vector<4x32xf32>
    %180 = math.tanh %179 : vector<4x32xf32>
    %181 = arith.mulf %176, %180 : vector<4x32xf32>
    %182 = vector.extract_strided_slice %181 {offsets = [0, 0], sizes = [2, 32], strides = [1, 1]} : vector<4x32xf32> to vector<2x32xf32>
    %183 = vector.extract_strided_slice %181 {offsets = [2, 0], sizes = [2, 32], strides = [1, 1]} : vector<4x32xf32> to vector<2x32xf32>
    %cst_29 = arith.constant dense<0.000000e+00> : vector<4x256xf32>
    %184 = tpu.matmul %181, %2, %cst_29 {dimension_numbers = #tpu.dot_dimension_numbers<[1], [0], [0], [1], [0, 0, 1, 1], [], []>} : vector<4x32xf32>, vector<32x256xf32>, vector<4x256xf32> -> vector<4x256xf32>
    %185 = vector.extract_strided_slice %6 {offsets = [10, 0], sizes = [2, 128], strides = [1, 1]} : vector<16x256xf32> to vector<2x128xf32>
    %186 = vector.extract_strided_slice %184 {offsets = [0, 0], sizes = [2, 128], strides = [1, 1]} : vector<4x256xf32> to vector<2x128xf32>
    %187 = arith.addf %185, %186 : vector<2x128xf32>
    %188 = vector.extract_strided_slice %6 {offsets = [4, 128], sizes = [2, 128], strides = [1, 1]} : vector<16x256xf32> to vector<2x128xf32>
    %189 = vector.extract_strided_slice %184 {offsets = [2, 128], sizes = [2, 128], strides = [1, 1]} : vector<4x256xf32> to vector<2x128xf32>
    %190 = arith.addf %188, %189 : vector<2x128xf32>
    %191 = tpu.concatenate %187, %190 in 0 : vector<2x128xf32>, vector<2x128xf32> -> vector<4x128xf32>
    %192 = vector.extract_strided_slice %191 {offsets = [0, 0], sizes = [4, 32], strides = [1, 1]} : vector<4x128xf32> to vector<4x32xf32>
    %193 = arith.negf %192 : vector<4x32xf32>
    %194 = math.exp %193 : vector<4x32xf32>
    %cst_30 = arith.constant 1.000000e+00 : f32
    %195 = vector.broadcast %cst_30 : f32 to vector<4x32xf32>
    %196 = arith.addf %195, %194 : vector<4x32xf32>
    %197 = arith.divf %195, %196 : vector<4x32xf32>
    %198 = vector.extract_strided_slice %191 {offsets = [0, 32], sizes = [4, 32], strides = [1, 1]} : vector<4x128xf32> to vector<4x32xf32>
    %199 = arith.negf %198 : vector<4x32xf32>
    %200 = math.exp %199 : vector<4x32xf32>
    %cst_31 = arith.constant 1.000000e+00 : f32
    %201 = vector.broadcast %cst_31 : f32 to vector<4x32xf32>
    %202 = arith.addf %201, %200 : vector<4x32xf32>
    %203 = arith.divf %201, %202 : vector<4x32xf32>
    %204 = vector.extract_strided_slice %191 {offsets = [0, 64], sizes = [4, 32], strides = [1, 1]} : vector<4x128xf32> to vector<4x32xf32>
    %205 = math.tanh %204 : vector<4x32xf32>
    %206 = vector.extract_strided_slice %191 {offsets = [0, 96], sizes = [4, 32], strides = [1, 1]} : vector<4x128xf32> to vector<4x32xf32>
    %207 = arith.negf %206 : vector<4x32xf32>
    %208 = math.exp %207 : vector<4x32xf32>
    %cst_32 = arith.constant 1.000000e+00 : f32
    %209 = vector.broadcast %cst_32 : f32 to vector<4x32xf32>
    %210 = arith.addf %209, %208 : vector<4x32xf32>
    %211 = arith.divf %209, %210 : vector<4x32xf32>
    %212 = arith.mulf %203, %179 : vector<4x32xf32>
    %213 = arith.mulf %197, %205 : vector<4x32xf32>
    %214 = arith.addf %212, %213 : vector<4x32xf32>
    %215 = math.tanh %214 : vector<4x32xf32>
    %216 = arith.mulf %211, %215 : vector<4x32xf32>
    %217 = vector.extract_strided_slice %216 {offsets = [0, 0], sizes = [2, 32], strides = [1, 1]} : vector<4x32xf32> to vector<2x32xf32>
    %218 = vector.extract_strided_slice %216 {offsets = [2, 0], sizes = [2, 32], strides = [1, 1]} : vector<4x32xf32> to vector<2x32xf32>
    %cst_33 = arith.constant dense<0.000000e+00> : vector<4x256xf32>
    %219 = tpu.matmul %216, %2, %cst_33 {dimension_numbers = #tpu.dot_dimension_numbers<[1], [0], [0], [1], [0, 0, 1, 1], [], []>} : vector<4x32xf32>, vector<32x256xf32>, vector<4x256xf32> -> vector<4x256xf32>
    %220 = vector.extract_strided_slice %6 {offsets = [12, 0], sizes = [2, 128], strides = [1, 1]} : vector<16x256xf32> to vector<2x128xf32>
    %221 = vector.extract_strided_slice %219 {offsets = [0, 0], sizes = [2, 128], strides = [1, 1]} : vector<4x256xf32> to vector<2x128xf32>
    %222 = arith.addf %220, %221 : vector<2x128xf32>
    %223 = vector.extract_strided_slice %6 {offsets = [2, 128], sizes = [2, 128], strides = [1, 1]} : vector<16x256xf32> to vector<2x128xf32>
    %224 = vector.extract_strided_slice %219 {offsets = [2, 128], sizes = [2, 128], strides = [1, 1]} : vector<4x256xf32> to vector<2x128xf32>
    %225 = arith.addf %223, %224 : vector<2x128xf32>
    %226 = tpu.concatenate %222, %225 in 0 : vector<2x128xf32>, vector<2x128xf32> -> vector<4x128xf32>
    %227 = vector.extract_strided_slice %226 {offsets = [0, 0], sizes = [4, 32], strides = [1, 1]} : vector<4x128xf32> to vector<4x32xf32>
    %228 = arith.negf %227 : vector<4x32xf32>
    %229 = math.exp %228 : vector<4x32xf32>
    %cst_34 = arith.constant 1.000000e+00 : f32
    %230 = vector.broadcast %cst_34 : f32 to vector<4x32xf32>
    %231 = arith.addf %230, %229 : vector<4x32xf32>
    %232 = arith.divf %230, %231 : vector<4x32xf32>
    %233 = vector.extract_strided_slice %226 {offsets = [0, 32], sizes = [4, 32], strides = [1, 1]} : vector<4x128xf32> to vector<4x32xf32>
    %234 = arith.negf %233 : vector<4x32xf32>
    %235 = math.exp %234 : vector<4x32xf32>
    %cst_35 = arith.constant 1.000000e+00 : f32
    %236 = vector.broadcast %cst_35 : f32 to vector<4x32xf32>
    %237 = arith.addf %236, %235 : vector<4x32xf32>
    %238 = arith.divf %236, %237 : vector<4x32xf32>
    %239 = vector.extract_strided_slice %226 {offsets = [0, 64], sizes = [4, 32], strides = [1, 1]} : vector<4x128xf32> to vector<4x32xf32>
    %240 = math.tanh %239 : vector<4x32xf32>
    %241 = vector.extract_strided_slice %226 {offsets = [0, 96], sizes = [4, 32], strides = [1, 1]} : vector<4x128xf32> to vector<4x32xf32>
    %242 = arith.negf %241 : vector<4x32xf32>
    %243 = math.exp %242 : vector<4x32xf32>
    %cst_36 = arith.constant 1.000000e+00 : f32
    %244 = vector.broadcast %cst_36 : f32 to vector<4x32xf32>
    %245 = arith.addf %244, %243 : vector<4x32xf32>
    %246 = arith.divf %244, %245 : vector<4x32xf32>
    %247 = arith.mulf %238, %214 : vector<4x32xf32>
    %248 = arith.mulf %232, %240 : vector<4x32xf32>
    %249 = arith.addf %247, %248 : vector<4x32xf32>
    %250 = math.tanh %249 : vector<4x32xf32>
    %251 = arith.mulf %246, %250 : vector<4x32xf32>
    %252 = vector.extract_strided_slice %251 {offsets = [0, 0], sizes = [2, 32], strides = [1, 1]} : vector<4x32xf32> to vector<2x32xf32>
    %253 = vector.extract_strided_slice %251 {offsets = [2, 0], sizes = [2, 32], strides = [1, 1]} : vector<4x32xf32> to vector<2x32xf32>
    %cst_37 = arith.constant dense<0.000000e+00> : vector<4x256xf32>
    %254 = tpu.matmul %251, %2, %cst_37 {dimension_numbers = #tpu.dot_dimension_numbers<[1], [0], [0], [1], [0, 0, 1, 1], [], []>} : vector<4x32xf32>, vector<32x256xf32>, vector<4x256xf32> -> vector<4x256xf32>
    %255 = vector.extract_strided_slice %6 {offsets = [14, 0], sizes = [2, 128], strides = [1, 1]} : vector<16x256xf32> to vector<2x128xf32>
    %256 = vector.extract_strided_slice %254 {offsets = [0, 0], sizes = [2, 128], strides = [1, 1]} : vector<4x256xf32> to vector<2x128xf32>
    %257 = arith.addf %255, %256 : vector<2x128xf32>
    %258 = vector.extract_strided_slice %6 {offsets = [0, 128], sizes = [2, 128], strides = [1, 1]} : vector<16x256xf32> to vector<2x128xf32>
    %259 = vector.extract_strided_slice %254 {offsets = [2, 128], sizes = [2, 128], strides = [1, 1]} : vector<4x256xf32> to vector<2x128xf32>
    %260 = arith.addf %258, %259 : vector<2x128xf32>
    %261 = tpu.concatenate %257, %260 in 0 : vector<2x128xf32>, vector<2x128xf32> -> vector<4x128xf32>
    %262 = vector.extract_strided_slice %261 {offsets = [0, 0], sizes = [4, 32], strides = [1, 1]} : vector<4x128xf32> to vector<4x32xf32>
    %263 = arith.negf %262 : vector<4x32xf32>
    %264 = math.exp %263 : vector<4x32xf32>
    %cst_38 = arith.constant 1.000000e+00 : f32
    %265 = vector.broadcast %cst_38 : f32 to vector<4x32xf32>
    %266 = arith.addf %265, %264 : vector<4x32xf32>
    %267 = arith.divf %265, %266 : vector<4x32xf32>
    %268 = vector.extract_strided_slice %261 {offsets = [0, 32], sizes = [4, 32], strides = [1, 1]} : vector<4x128xf32> to vector<4x32xf32>
    %269 = arith.negf %268 : vector<4x32xf32>
    %270 = math.exp %269 : vector<4x32xf32>
    %cst_39 = arith.constant 1.000000e+00 : f32
    %271 = vector.broadcast %cst_39 : f32 to vector<4x32xf32>
    %272 = arith.addf %271, %270 : vector<4x32xf32>
    %273 = arith.divf %271, %272 : vector<4x32xf32>
    %274 = vector.extract_strided_slice %261 {offsets = [0, 64], sizes = [4, 32], strides = [1, 1]} : vector<4x128xf32> to vector<4x32xf32>
    %275 = math.tanh %274 : vector<4x32xf32>
    %276 = vector.extract_strided_slice %261 {offsets = [0, 96], sizes = [4, 32], strides = [1, 1]} : vector<4x128xf32> to vector<4x32xf32>
    %277 = arith.negf %276 : vector<4x32xf32>
    %278 = math.exp %277 : vector<4x32xf32>
    %cst_40 = arith.constant 1.000000e+00 : f32
    %279 = vector.broadcast %cst_40 : f32 to vector<4x32xf32>
    %280 = arith.addf %279, %278 : vector<4x32xf32>
    %281 = arith.divf %279, %280 : vector<4x32xf32>
    %282 = arith.mulf %273, %249 : vector<4x32xf32>
    %283 = arith.mulf %267, %275 : vector<4x32xf32>
    %284 = arith.addf %282, %283 : vector<4x32xf32>
    %285 = math.tanh %284 : vector<4x32xf32>
    %286 = arith.mulf %281, %285 : vector<4x32xf32>
    %287 = vector.extract_strided_slice %286 {offsets = [0, 0], sizes = [2, 32], strides = [1, 1]} : vector<4x32xf32> to vector<2x32xf32>
    %288 = vector.extract_strided_slice %286 {offsets = [2, 0], sizes = [2, 32], strides = [1, 1]} : vector<4x32xf32> to vector<2x32xf32>
    %289 = tpu.concatenate %42, %288 in 1 : vector<2x32xf32>, vector<2x32xf32> -> vector<2x64xf32>
    %290 = tpu.concatenate %77, %253 in 1 : vector<2x32xf32>, vector<2x32xf32> -> vector<2x64xf32>
    %291 = tpu.concatenate %112, %218 in 1 : vector<2x32xf32>, vector<2x32xf32> -> vector<2x64xf32>
    %292 = tpu.concatenate %147, %183 in 1 : vector<2x32xf32>, vector<2x32xf32> -> vector<2x64xf32>
    %293 = tpu.concatenate %182, %148 in 1 : vector<2x32xf32>, vector<2x32xf32> -> vector<2x64xf32>
    %294 = tpu.concatenate %217, %113 in 1 : vector<2x32xf32>, vector<2x32xf32> -> vector<2x64xf32>
    %295 = tpu.concatenate %252, %78 in 1 : vector<2x32xf32>, vector<2x32xf32> -> vector<2x64xf32>
    %296 = tpu.concatenate %287, %43 in 1 : vector<2x32xf32>, vector<2x32xf32> -> vector<2x64xf32>
    %297 = tpu.concatenate %289, %290, %291, %292, %293, %294, %295, %296 in 0 : vector<2x64xf32>, vector<2x64xf32>, vector<2x64xf32>, vector<2x64xf32>, vector<2x64xf32>, vector<2x64xf32>, vector<2x64xf32>, vector<2x64xf32> -> vector<16x64xf32>
    %c0_41 = arith.constant 0 : index
    %c0_42 = arith.constant 0 : index
    %298 = vector.load %arg6[%c0_41, %c0_42] : memref<64x256xf32, #tpu.memory_space<vmem>>, vector<64x256xf32>
    %c0_43 = arith.constant 0 : index
    %c0_44 = arith.constant 0 : index
    %299 = vector.load %arg7[%c0_43, %c0_44] : memref<32x256xf32, #tpu.memory_space<vmem>>, vector<32x256xf32>
    %c0_45 = arith.constant 0 : index
    %c0_46 = arith.constant 0 : index
    %300 = vector.load %arg8[%c0_45, %c0_46] : memref<1x256xf32, #tpu.memory_space<vmem>>, vector<1x256xf32>
    %cst_47 = arith.constant dense<0.000000e+00> : vector<16x256xf32>
    %301 = tpu.matmul %297, %298, %cst_47 {dimension_numbers = #tpu.dot_dimension_numbers<[1], [0], [0], [1], [0, 0, 1, 1], [], []>} : vector<16x64xf32>, vector<64x256xf32>, vector<16x256xf32> -> vector<16x256xf32>
    %302 = vector.broadcast %300 : vector<1x256xf32> to vector<16x256xf32>
    %303 = arith.addf %301, %302 : vector<16x256xf32>
    %cst_48 = arith.constant 0.000000e+00 : f32
    %304 = vector.broadcast %cst_48 : f32 to vector<4x32xf32>
    %cst_49 = arith.constant 0.000000e+00 : f32
    %305 = vector.broadcast %cst_49 : f32 to vector<4x32xf32>
    %cst_50 = arith.constant dense<0.000000e+00> : vector<4x256xf32>
    %306 = tpu.matmul %304, %299, %cst_50 {dimension_numbers = #tpu.dot_dimension_numbers<[1], [0], [0], [1], [0, 0, 1, 1], [], []>} : vector<4x32xf32>, vector<32x256xf32>, vector<4x256xf32> -> vector<4x256xf32>
    %307 = vector.extract_strided_slice %303 {offsets = [0, 0], sizes = [2, 128], strides = [1, 1]} : vector<16x256xf32> to vector<2x128xf32>
    %308 = vector.extract_strided_slice %306 {offsets = [0, 0], sizes = [2, 128], strides = [1, 1]} : vector<4x256xf32> to vector<2x128xf32>
    %309 = arith.addf %307, %308 : vector<2x128xf32>
    %310 = vector.extract_strided_slice %303 {offsets = [14, 128], sizes = [2, 128], strides = [1, 1]} : vector<16x256xf32> to vector<2x128xf32>
    %311 = vector.extract_strided_slice %306 {offsets = [2, 128], sizes = [2, 128], strides = [1, 1]} : vector<4x256xf32> to vector<2x128xf32>
    %312 = arith.addf %310, %311 : vector<2x128xf32>
    %313 = tpu.concatenate %309, %312 in 0 : vector<2x128xf32>, vector<2x128xf32> -> vector<4x128xf32>
    %314 = vector.extract_strided_slice %313 {offsets = [0, 0], sizes = [4, 32], strides = [1, 1]} : vector<4x128xf32> to vector<4x32xf32>
    %315 = arith.negf %314 : vector<4x32xf32>
    %316 = math.exp %315 : vector<4x32xf32>
    %cst_51 = arith.constant 1.000000e+00 : f32
    %317 = vector.broadcast %cst_51 : f32 to vector<4x32xf32>
    %318 = arith.addf %317, %316 : vector<4x32xf32>
    %319 = arith.divf %317, %318 : vector<4x32xf32>
    %320 = vector.extract_strided_slice %313 {offsets = [0, 32], sizes = [4, 32], strides = [1, 1]} : vector<4x128xf32> to vector<4x32xf32>
    %321 = arith.negf %320 : vector<4x32xf32>
    %322 = math.exp %321 : vector<4x32xf32>
    %cst_52 = arith.constant 1.000000e+00 : f32
    %323 = vector.broadcast %cst_52 : f32 to vector<4x32xf32>
    %324 = arith.addf %323, %322 : vector<4x32xf32>
    %325 = arith.divf %323, %324 : vector<4x32xf32>
    %326 = vector.extract_strided_slice %313 {offsets = [0, 64], sizes = [4, 32], strides = [1, 1]} : vector<4x128xf32> to vector<4x32xf32>
    %327 = math.tanh %326 : vector<4x32xf32>
    %328 = vector.extract_strided_slice %313 {offsets = [0, 96], sizes = [4, 32], strides = [1, 1]} : vector<4x128xf32> to vector<4x32xf32>
    %329 = arith.negf %328 : vector<4x32xf32>
    %330 = math.exp %329 : vector<4x32xf32>
    %cst_53 = arith.constant 1.000000e+00 : f32
    %331 = vector.broadcast %cst_53 : f32 to vector<4x32xf32>
    %332 = arith.addf %331, %330 : vector<4x32xf32>
    %333 = arith.divf %331, %332 : vector<4x32xf32>
    %334 = arith.mulf %325, %305 : vector<4x32xf32>
    %335 = arith.mulf %319, %327 : vector<4x32xf32>
    %336 = arith.addf %334, %335 : vector<4x32xf32>
    %337 = math.tanh %336 : vector<4x32xf32>
    %338 = arith.mulf %333, %337 : vector<4x32xf32>
    %339 = vector.extract_strided_slice %338 {offsets = [0, 0], sizes = [2, 32], strides = [1, 1]} : vector<4x32xf32> to vector<2x32xf32>
    %340 = vector.extract_strided_slice %338 {offsets = [2, 0], sizes = [2, 32], strides = [1, 1]} : vector<4x32xf32> to vector<2x32xf32>
    %cst_54 = arith.constant dense<0.000000e+00> : vector<4x256xf32>
    %341 = tpu.matmul %338, %299, %cst_54 {dimension_numbers = #tpu.dot_dimension_numbers<[1], [0], [0], [1], [0, 0, 1, 1], [], []>} : vector<4x32xf32>, vector<32x256xf32>, vector<4x256xf32> -> vector<4x256xf32>
    %342 = vector.extract_strided_slice %303 {offsets = [2, 0], sizes = [2, 128], strides = [1, 1]} : vector<16x256xf32> to vector<2x128xf32>
    %343 = vector.extract_strided_slice %341 {offsets = [0, 0], sizes = [2, 128], strides = [1, 1]} : vector<4x256xf32> to vector<2x128xf32>
    %344 = arith.addf %342, %343 : vector<2x128xf32>
    %345 = vector.extract_strided_slice %303 {offsets = [12, 128], sizes = [2, 128], strides = [1, 1]} : vector<16x256xf32> to vector<2x128xf32>
    %346 = vector.extract_strided_slice %341 {offsets = [2, 128], sizes = [2, 128], strides = [1, 1]} : vector<4x256xf32> to vector<2x128xf32>
    %347 = arith.addf %345, %346 : vector<2x128xf32>
    %348 = tpu.concatenate %344, %347 in 0 : vector<2x128xf32>, vector<2x128xf32> -> vector<4x128xf32>
    %349 = vector.extract_strided_slice %348 {offsets = [0, 0], sizes = [4, 32], strides = [1, 1]} : vector<4x128xf32> to vector<4x32xf32>
    %350 = arith.negf %349 : vector<4x32xf32>
    %351 = math.exp %350 : vector<4x32xf32>
    %cst_55 = arith.constant 1.000000e+00 : f32
    %352 = vector.broadcast %cst_55 : f32 to vector<4x32xf32>
    %353 = arith.addf %352, %351 : vector<4x32xf32>
    %354 = arith.divf %352, %353 : vector<4x32xf32>
    %355 = vector.extract_strided_slice %348 {offsets = [0, 32], sizes = [4, 32], strides = [1, 1]} : vector<4x128xf32> to vector<4x32xf32>
    %356 = arith.negf %355 : vector<4x32xf32>
    %357 = math.exp %356 : vector<4x32xf32>
    %cst_56 = arith.constant 1.000000e+00 : f32
    %358 = vector.broadcast %cst_56 : f32 to vector<4x32xf32>
    %359 = arith.addf %358, %357 : vector<4x32xf32>
    %360 = arith.divf %358, %359 : vector<4x32xf32>
    %361 = vector.extract_strided_slice %348 {offsets = [0, 64], sizes = [4, 32], strides = [1, 1]} : vector<4x128xf32> to vector<4x32xf32>
    %362 = math.tanh %361 : vector<4x32xf32>
    %363 = vector.extract_strided_slice %348 {offsets = [0, 96], sizes = [4, 32], strides = [1, 1]} : vector<4x128xf32> to vector<4x32xf32>
    %364 = arith.negf %363 : vector<4x32xf32>
    %365 = math.exp %364 : vector<4x32xf32>
    %cst_57 = arith.constant 1.000000e+00 : f32
    %366 = vector.broadcast %cst_57 : f32 to vector<4x32xf32>
    %367 = arith.addf %366, %365 : vector<4x32xf32>
    %368 = arith.divf %366, %367 : vector<4x32xf32>
    %369 = arith.mulf %360, %336 : vector<4x32xf32>
    %370 = arith.mulf %354, %362 : vector<4x32xf32>
    %371 = arith.addf %369, %370 : vector<4x32xf32>
    %372 = math.tanh %371 : vector<4x32xf32>
    %373 = arith.mulf %368, %372 : vector<4x32xf32>
    %374 = vector.extract_strided_slice %373 {offsets = [0, 0], sizes = [2, 32], strides = [1, 1]} : vector<4x32xf32> to vector<2x32xf32>
    %375 = vector.extract_strided_slice %373 {offsets = [2, 0], sizes = [2, 32], strides = [1, 1]} : vector<4x32xf32> to vector<2x32xf32>
    %cst_58 = arith.constant dense<0.000000e+00> : vector<4x256xf32>
    %376 = tpu.matmul %373, %299, %cst_58 {dimension_numbers = #tpu.dot_dimension_numbers<[1], [0], [0], [1], [0, 0, 1, 1], [], []>} : vector<4x32xf32>, vector<32x256xf32>, vector<4x256xf32> -> vector<4x256xf32>
    %377 = vector.extract_strided_slice %303 {offsets = [4, 0], sizes = [2, 128], strides = [1, 1]} : vector<16x256xf32> to vector<2x128xf32>
    %378 = vector.extract_strided_slice %376 {offsets = [0, 0], sizes = [2, 128], strides = [1, 1]} : vector<4x256xf32> to vector<2x128xf32>
    %379 = arith.addf %377, %378 : vector<2x128xf32>
    %380 = vector.extract_strided_slice %303 {offsets = [10, 128], sizes = [2, 128], strides = [1, 1]} : vector<16x256xf32> to vector<2x128xf32>
    %381 = vector.extract_strided_slice %376 {offsets = [2, 128], sizes = [2, 128], strides = [1, 1]} : vector<4x256xf32> to vector<2x128xf32>
    %382 = arith.addf %380, %381 : vector<2x128xf32>
    %383 = tpu.concatenate %379, %382 in 0 : vector<2x128xf32>, vector<2x128xf32> -> vector<4x128xf32>
    %384 = vector.extract_strided_slice %383 {offsets = [0, 0], sizes = [4, 32], strides = [1, 1]} : vector<4x128xf32> to vector<4x32xf32>
    %385 = arith.negf %384 : vector<4x32xf32>
    %386 = math.exp %385 : vector<4x32xf32>
    %cst_59 = arith.constant 1.000000e+00 : f32
    %387 = vector.broadcast %cst_59 : f32 to vector<4x32xf32>
    %388 = arith.addf %387, %386 : vector<4x32xf32>
    %389 = arith.divf %387, %388 : vector<4x32xf32>
    %390 = vector.extract_strided_slice %383 {offsets = [0, 32], sizes = [4, 32], strides = [1, 1]} : vector<4x128xf32> to vector<4x32xf32>
    %391 = arith.negf %390 : vector<4x32xf32>
    %392 = math.exp %391 : vector<4x32xf32>
    %cst_60 = arith.constant 1.000000e+00 : f32
    %393 = vector.broadcast %cst_60 : f32 to vector<4x32xf32>
    %394 = arith.addf %393, %392 : vector<4x32xf32>
    %395 = arith.divf %393, %394 : vector<4x32xf32>
    %396 = vector.extract_strided_slice %383 {offsets = [0, 64], sizes = [4, 32], strides = [1, 1]} : vector<4x128xf32> to vector<4x32xf32>
    %397 = math.tanh %396 : vector<4x32xf32>
    %398 = vector.extract_strided_slice %383 {offsets = [0, 96], sizes = [4, 32], strides = [1, 1]} : vector<4x128xf32> to vector<4x32xf32>
    %399 = arith.negf %398 : vector<4x32xf32>
    %400 = math.exp %399 : vector<4x32xf32>
    %cst_61 = arith.constant 1.000000e+00 : f32
    %401 = vector.broadcast %cst_61 : f32 to vector<4x32xf32>
    %402 = arith.addf %401, %400 : vector<4x32xf32>
    %403 = arith.divf %401, %402 : vector<4x32xf32>
    %404 = arith.mulf %395, %371 : vector<4x32xf32>
    %405 = arith.mulf %389, %397 : vector<4x32xf32>
    %406 = arith.addf %404, %405 : vector<4x32xf32>
    %407 = math.tanh %406 : vector<4x32xf32>
    %408 = arith.mulf %403, %407 : vector<4x32xf32>
    %409 = vector.extract_strided_slice %408 {offsets = [0, 0], sizes = [2, 32], strides = [1, 1]} : vector<4x32xf32> to vector<2x32xf32>
    %410 = vector.extract_strided_slice %408 {offsets = [2, 0], sizes = [2, 32], strides = [1, 1]} : vector<4x32xf32> to vector<2x32xf32>
    %cst_62 = arith.constant dense<0.000000e+00> : vector<4x256xf32>
    %411 = tpu.matmul %408, %299, %cst_62 {dimension_numbers = #tpu.dot_dimension_numbers<[1], [0], [0], [1], [0, 0, 1, 1], [], []>} : vector<4x32xf32>, vector<32x256xf32>, vector<4x256xf32> -> vector<4x256xf32>
    %412 = vector.extract_strided_slice %303 {offsets = [6, 0], sizes = [2, 128], strides = [1, 1]} : vector<16x256xf32> to vector<2x128xf32>
    %413 = vector.extract_strided_slice %411 {offsets = [0, 0], sizes = [2, 128], strides = [1, 1]} : vector<4x256xf32> to vector<2x128xf32>
    %414 = arith.addf %412, %413 : vector<2x128xf32>
    %415 = vector.extract_strided_slice %303 {offsets = [8, 128], sizes = [2, 128], strides = [1, 1]} : vector<16x256xf32> to vector<2x128xf32>
    %416 = vector.extract_strided_slice %411 {offsets = [2, 128], sizes = [2, 128], strides = [1, 1]} : vector<4x256xf32> to vector<2x128xf32>
    %417 = arith.addf %415, %416 : vector<2x128xf32>
    %418 = tpu.concatenate %414, %417 in 0 : vector<2x128xf32>, vector<2x128xf32> -> vector<4x128xf32>
    %419 = vector.extract_strided_slice %418 {offsets = [0, 0], sizes = [4, 32], strides = [1, 1]} : vector<4x128xf32> to vector<4x32xf32>
    %420 = arith.negf %419 : vector<4x32xf32>
    %421 = math.exp %420 : vector<4x32xf32>
    %cst_63 = arith.constant 1.000000e+00 : f32
    %422 = vector.broadcast %cst_63 : f32 to vector<4x32xf32>
    %423 = arith.addf %422, %421 : vector<4x32xf32>
    %424 = arith.divf %422, %423 : vector<4x32xf32>
    %425 = vector.extract_strided_slice %418 {offsets = [0, 32], sizes = [4, 32], strides = [1, 1]} : vector<4x128xf32> to vector<4x32xf32>
    %426 = arith.negf %425 : vector<4x32xf32>
    %427 = math.exp %426 : vector<4x32xf32>
    %cst_64 = arith.constant 1.000000e+00 : f32
    %428 = vector.broadcast %cst_64 : f32 to vector<4x32xf32>
    %429 = arith.addf %428, %427 : vector<4x32xf32>
    %430 = arith.divf %428, %429 : vector<4x32xf32>
    %431 = vector.extract_strided_slice %418 {offsets = [0, 64], sizes = [4, 32], strides = [1, 1]} : vector<4x128xf32> to vector<4x32xf32>
    %432 = math.tanh %431 : vector<4x32xf32>
    %433 = vector.extract_strided_slice %418 {offsets = [0, 96], sizes = [4, 32], strides = [1, 1]} : vector<4x128xf32> to vector<4x32xf32>
    %434 = arith.negf %433 : vector<4x32xf32>
    %435 = math.exp %434 : vector<4x32xf32>
    %cst_65 = arith.constant 1.000000e+00 : f32
    %436 = vector.broadcast %cst_65 : f32 to vector<4x32xf32>
    %437 = arith.addf %436, %435 : vector<4x32xf32>
    %438 = arith.divf %436, %437 : vector<4x32xf32>
    %439 = arith.mulf %430, %406 : vector<4x32xf32>
    %440 = arith.mulf %424, %432 : vector<4x32xf32>
    %441 = arith.addf %439, %440 : vector<4x32xf32>
    %442 = math.tanh %441 : vector<4x32xf32>
    %443 = arith.mulf %438, %442 : vector<4x32xf32>
    %444 = vector.extract_strided_slice %443 {offsets = [0, 0], sizes = [2, 32], strides = [1, 1]} : vector<4x32xf32> to vector<2x32xf32>
    %445 = vector.extract_strided_slice %443 {offsets = [2, 0], sizes = [2, 32], strides = [1, 1]} : vector<4x32xf32> to vector<2x32xf32>
    %cst_66 = arith.constant dense<0.000000e+00> : vector<4x256xf32>
    %446 = tpu.matmul %443, %299, %cst_66 {dimension_numbers = #tpu.dot_dimension_numbers<[1], [0], [0], [1], [0, 0, 1, 1], [], []>} : vector<4x32xf32>, vector<32x256xf32>, vector<4x256xf32> -> vector<4x256xf32>
    %447 = vector.extract_strided_slice %303 {offsets = [8, 0], sizes = [2, 128], strides = [1, 1]} : vector<16x256xf32> to vector<2x128xf32>
    %448 = vector.extract_strided_slice %446 {offsets = [0, 0], sizes = [2, 128], strides = [1, 1]} : vector<4x256xf32> to vector<2x128xf32>
    %449 = arith.addf %447, %448 : vector<2x128xf32>
    %450 = vector.extract_strided_slice %303 {offsets = [6, 128], sizes = [2, 128], strides = [1, 1]} : vector<16x256xf32> to vector<2x128xf32>
    %451 = vector.extract_strided_slice %446 {offsets = [2, 128], sizes = [2, 128], strides = [1, 1]} : vector<4x256xf32> to vector<2x128xf32>
    %452 = arith.addf %450, %451 : vector<2x128xf32>
    %453 = tpu.concatenate %449, %452 in 0 : vector<2x128xf32>, vector<2x128xf32> -> vector<4x128xf32>
    %454 = vector.extract_strided_slice %453 {offsets = [0, 0], sizes = [4, 32], strides = [1, 1]} : vector<4x128xf32> to vector<4x32xf32>
    %455 = arith.negf %454 : vector<4x32xf32>
    %456 = math.exp %455 : vector<4x32xf32>
    %cst_67 = arith.constant 1.000000e+00 : f32
    %457 = vector.broadcast %cst_67 : f32 to vector<4x32xf32>
    %458 = arith.addf %457, %456 : vector<4x32xf32>
    %459 = arith.divf %457, %458 : vector<4x32xf32>
    %460 = vector.extract_strided_slice %453 {offsets = [0, 32], sizes = [4, 32], strides = [1, 1]} : vector<4x128xf32> to vector<4x32xf32>
    %461 = arith.negf %460 : vector<4x32xf32>
    %462 = math.exp %461 : vector<4x32xf32>
    %cst_68 = arith.constant 1.000000e+00 : f32
    %463 = vector.broadcast %cst_68 : f32 to vector<4x32xf32>
    %464 = arith.addf %463, %462 : vector<4x32xf32>
    %465 = arith.divf %463, %464 : vector<4x32xf32>
    %466 = vector.extract_strided_slice %453 {offsets = [0, 64], sizes = [4, 32], strides = [1, 1]} : vector<4x128xf32> to vector<4x32xf32>
    %467 = math.tanh %466 : vector<4x32xf32>
    %468 = vector.extract_strided_slice %453 {offsets = [0, 96], sizes = [4, 32], strides = [1, 1]} : vector<4x128xf32> to vector<4x32xf32>
    %469 = arith.negf %468 : vector<4x32xf32>
    %470 = math.exp %469 : vector<4x32xf32>
    %cst_69 = arith.constant 1.000000e+00 : f32
    %471 = vector.broadcast %cst_69 : f32 to vector<4x32xf32>
    %472 = arith.addf %471, %470 : vector<4x32xf32>
    %473 = arith.divf %471, %472 : vector<4x32xf32>
    %474 = arith.mulf %465, %441 : vector<4x32xf32>
    %475 = arith.mulf %459, %467 : vector<4x32xf32>
    %476 = arith.addf %474, %475 : vector<4x32xf32>
    %477 = math.tanh %476 : vector<4x32xf32>
    %478 = arith.mulf %473, %477 : vector<4x32xf32>
    %479 = vector.extract_strided_slice %478 {offsets = [0, 0], sizes = [2, 32], strides = [1, 1]} : vector<4x32xf32> to vector<2x32xf32>
    %480 = vector.extract_strided_slice %478 {offsets = [2, 0], sizes = [2, 32], strides = [1, 1]} : vector<4x32xf32> to vector<2x32xf32>
    %cst_70 = arith.constant dense<0.000000e+00> : vector<4x256xf32>
    %481 = tpu.matmul %478, %299, %cst_70 {dimension_numbers = #tpu.dot_dimension_numbers<[1], [0], [0], [1], [0, 0, 1, 1], [], []>} : vector<4x32xf32>, vector<32x256xf32>, vector<4x256xf32> -> vector<4x256xf32>
    %482 = vector.extract_strided_slice %303 {offsets = [10, 0], sizes = [2, 128], strides = [1, 1]} : vector<16x256xf32> to vector<2x128xf32>
    %483 = vector.extract_strided_slice %481 {offsets = [0, 0], sizes = [2, 128], strides = [1, 1]} : vector<4x256xf32> to vector<2x128xf32>
    %484 = arith.addf %482, %483 : vector<2x128xf32>
    %485 = vector.extract_strided_slice %303 {offsets = [4, 128], sizes = [2, 128], strides = [1, 1]} : vector<16x256xf32> to vector<2x128xf32>
    %486 = vector.extract_strided_slice %481 {offsets = [2, 128], sizes = [2, 128], strides = [1, 1]} : vector<4x256xf32> to vector<2x128xf32>
    %487 = arith.addf %485, %486 : vector<2x128xf32>
    %488 = tpu.concatenate %484, %487 in 0 : vector<2x128xf32>, vector<2x128xf32> -> vector<4x128xf32>
    %489 = vector.extract_strided_slice %488 {offsets = [0, 0], sizes = [4, 32], strides = [1, 1]} : vector<4x128xf32> to vector<4x32xf32>
    %490 = arith.negf %489 : vector<4x32xf32>
    %491 = math.exp %490 : vector<4x32xf32>
    %cst_71 = arith.constant 1.000000e+00 : f32
    %492 = vector.broadcast %cst_71 : f32 to vector<4x32xf32>
    %493 = arith.addf %492, %491 : vector<4x32xf32>
    %494 = arith.divf %492, %493 : vector<4x32xf32>
    %495 = vector.extract_strided_slice %488 {offsets = [0, 32], sizes = [4, 32], strides = [1, 1]} : vector<4x128xf32> to vector<4x32xf32>
    %496 = arith.negf %495 : vector<4x32xf32>
    %497 = math.exp %496 : vector<4x32xf32>
    %cst_72 = arith.constant 1.000000e+00 : f32
    %498 = vector.broadcast %cst_72 : f32 to vector<4x32xf32>
    %499 = arith.addf %498, %497 : vector<4x32xf32>
    %500 = arith.divf %498, %499 : vector<4x32xf32>
    %501 = vector.extract_strided_slice %488 {offsets = [0, 64], sizes = [4, 32], strides = [1, 1]} : vector<4x128xf32> to vector<4x32xf32>
    %502 = math.tanh %501 : vector<4x32xf32>
    %503 = vector.extract_strided_slice %488 {offsets = [0, 96], sizes = [4, 32], strides = [1, 1]} : vector<4x128xf32> to vector<4x32xf32>
    %504 = arith.negf %503 : vector<4x32xf32>
    %505 = math.exp %504 : vector<4x32xf32>
    %cst_73 = arith.constant 1.000000e+00 : f32
    %506 = vector.broadcast %cst_73 : f32 to vector<4x32xf32>
    %507 = arith.addf %506, %505 : vector<4x32xf32>
    %508 = arith.divf %506, %507 : vector<4x32xf32>
    %509 = arith.mulf %500, %476 : vector<4x32xf32>
    %510 = arith.mulf %494, %502 : vector<4x32xf32>
    %511 = arith.addf %509, %510 : vector<4x32xf32>
    %512 = math.tanh %511 : vector<4x32xf32>
    %513 = arith.mulf %508, %512 : vector<4x32xf32>
    %514 = vector.extract_strided_slice %513 {offsets = [0, 0], sizes = [2, 32], strides = [1, 1]} : vector<4x32xf32> to vector<2x32xf32>
    %515 = vector.extract_strided_slice %513 {offsets = [2, 0], sizes = [2, 32], strides = [1, 1]} : vector<4x32xf32> to vector<2x32xf32>
    %cst_74 = arith.constant dense<0.000000e+00> : vector<4x256xf32>
    %516 = tpu.matmul %513, %299, %cst_74 {dimension_numbers = #tpu.dot_dimension_numbers<[1], [0], [0], [1], [0, 0, 1, 1], [], []>} : vector<4x32xf32>, vector<32x256xf32>, vector<4x256xf32> -> vector<4x256xf32>
    %517 = vector.extract_strided_slice %303 {offsets = [12, 0], sizes = [2, 128], strides = [1, 1]} : vector<16x256xf32> to vector<2x128xf32>
    %518 = vector.extract_strided_slice %516 {offsets = [0, 0], sizes = [2, 128], strides = [1, 1]} : vector<4x256xf32> to vector<2x128xf32>
    %519 = arith.addf %517, %518 : vector<2x128xf32>
    %520 = vector.extract_strided_slice %303 {offsets = [2, 128], sizes = [2, 128], strides = [1, 1]} : vector<16x256xf32> to vector<2x128xf32>
    %521 = vector.extract_strided_slice %516 {offsets = [2, 128], sizes = [2, 128], strides = [1, 1]} : vector<4x256xf32> to vector<2x128xf32>
    %522 = arith.addf %520, %521 : vector<2x128xf32>
    %523 = tpu.concatenate %519, %522 in 0 : vector<2x128xf32>, vector<2x128xf32> -> vector<4x128xf32>
    %524 = vector.extract_strided_slice %523 {offsets = [0, 0], sizes = [4, 32], strides = [1, 1]} : vector<4x128xf32> to vector<4x32xf32>
    %525 = arith.negf %524 : vector<4x32xf32>
    %526 = math.exp %525 : vector<4x32xf32>
    %cst_75 = arith.constant 1.000000e+00 : f32
    %527 = vector.broadcast %cst_75 : f32 to vector<4x32xf32>
    %528 = arith.addf %527, %526 : vector<4x32xf32>
    %529 = arith.divf %527, %528 : vector<4x32xf32>
    %530 = vector.extract_strided_slice %523 {offsets = [0, 32], sizes = [4, 32], strides = [1, 1]} : vector<4x128xf32> to vector<4x32xf32>
    %531 = arith.negf %530 : vector<4x32xf32>
    %532 = math.exp %531 : vector<4x32xf32>
    %cst_76 = arith.constant 1.000000e+00 : f32
    %533 = vector.broadcast %cst_76 : f32 to vector<4x32xf32>
    %534 = arith.addf %533, %532 : vector<4x32xf32>
    %535 = arith.divf %533, %534 : vector<4x32xf32>
    %536 = vector.extract_strided_slice %523 {offsets = [0, 64], sizes = [4, 32], strides = [1, 1]} : vector<4x128xf32> to vector<4x32xf32>
    %537 = math.tanh %536 : vector<4x32xf32>
    %538 = vector.extract_strided_slice %523 {offsets = [0, 96], sizes = [4, 32], strides = [1, 1]} : vector<4x128xf32> to vector<4x32xf32>
    %539 = arith.negf %538 : vector<4x32xf32>
    %540 = math.exp %539 : vector<4x32xf32>
    %cst_77 = arith.constant 1.000000e+00 : f32
    %541 = vector.broadcast %cst_77 : f32 to vector<4x32xf32>
    %542 = arith.addf %541, %540 : vector<4x32xf32>
    %543 = arith.divf %541, %542 : vector<4x32xf32>
    %544 = arith.mulf %535, %511 : vector<4x32xf32>
    %545 = arith.mulf %529, %537 : vector<4x32xf32>
    %546 = arith.addf %544, %545 : vector<4x32xf32>
    %547 = math.tanh %546 : vector<4x32xf32>
    %548 = arith.mulf %543, %547 : vector<4x32xf32>
    %549 = vector.extract_strided_slice %548 {offsets = [0, 0], sizes = [2, 32], strides = [1, 1]} : vector<4x32xf32> to vector<2x32xf32>
    %550 = vector.extract_strided_slice %548 {offsets = [2, 0], sizes = [2, 32], strides = [1, 1]} : vector<4x32xf32> to vector<2x32xf32>
    %cst_78 = arith.constant dense<0.000000e+00> : vector<4x256xf32>
    %551 = tpu.matmul %548, %299, %cst_78 {dimension_numbers = #tpu.dot_dimension_numbers<[1], [0], [0], [1], [0, 0, 1, 1], [], []>} : vector<4x32xf32>, vector<32x256xf32>, vector<4x256xf32> -> vector<4x256xf32>
    %552 = vector.extract_strided_slice %303 {offsets = [14, 0], sizes = [2, 128], strides = [1, 1]} : vector<16x256xf32> to vector<2x128xf32>
    %553 = vector.extract_strided_slice %551 {offsets = [0, 0], sizes = [2, 128], strides = [1, 1]} : vector<4x256xf32> to vector<2x128xf32>
    %554 = arith.addf %552, %553 : vector<2x128xf32>
    %555 = vector.extract_strided_slice %303 {offsets = [0, 128], sizes = [2, 128], strides = [1, 1]} : vector<16x256xf32> to vector<2x128xf32>
    %556 = vector.extract_strided_slice %551 {offsets = [2, 128], sizes = [2, 128], strides = [1, 1]} : vector<4x256xf32> to vector<2x128xf32>
    %557 = arith.addf %555, %556 : vector<2x128xf32>
    %558 = tpu.concatenate %554, %557 in 0 : vector<2x128xf32>, vector<2x128xf32> -> vector<4x128xf32>
    %559 = vector.extract_strided_slice %558 {offsets = [0, 0], sizes = [4, 32], strides = [1, 1]} : vector<4x128xf32> to vector<4x32xf32>
    %560 = arith.negf %559 : vector<4x32xf32>
    %561 = math.exp %560 : vector<4x32xf32>
    %cst_79 = arith.constant 1.000000e+00 : f32
    %562 = vector.broadcast %cst_79 : f32 to vector<4x32xf32>
    %563 = arith.addf %562, %561 : vector<4x32xf32>
    %564 = arith.divf %562, %563 : vector<4x32xf32>
    %565 = vector.extract_strided_slice %558 {offsets = [0, 32], sizes = [4, 32], strides = [1, 1]} : vector<4x128xf32> to vector<4x32xf32>
    %566 = arith.negf %565 : vector<4x32xf32>
    %567 = math.exp %566 : vector<4x32xf32>
    %cst_80 = arith.constant 1.000000e+00 : f32
    %568 = vector.broadcast %cst_80 : f32 to vector<4x32xf32>
    %569 = arith.addf %568, %567 : vector<4x32xf32>
    %570 = arith.divf %568, %569 : vector<4x32xf32>
    %571 = vector.extract_strided_slice %558 {offsets = [0, 64], sizes = [4, 32], strides = [1, 1]} : vector<4x128xf32> to vector<4x32xf32>
    %572 = math.tanh %571 : vector<4x32xf32>
    %573 = vector.extract_strided_slice %558 {offsets = [0, 96], sizes = [4, 32], strides = [1, 1]} : vector<4x128xf32> to vector<4x32xf32>
    %574 = arith.negf %573 : vector<4x32xf32>
    %575 = math.exp %574 : vector<4x32xf32>
    %cst_81 = arith.constant 1.000000e+00 : f32
    %576 = vector.broadcast %cst_81 : f32 to vector<4x32xf32>
    %577 = arith.addf %576, %575 : vector<4x32xf32>
    %578 = arith.divf %576, %577 : vector<4x32xf32>
    %579 = arith.mulf %570, %546 : vector<4x32xf32>
    %580 = arith.mulf %564, %572 : vector<4x32xf32>
    %581 = arith.addf %579, %580 : vector<4x32xf32>
    %582 = math.tanh %581 : vector<4x32xf32>
    %583 = arith.mulf %578, %582 : vector<4x32xf32>
    %584 = vector.extract_strided_slice %583 {offsets = [0, 0], sizes = [2, 32], strides = [1, 1]} : vector<4x32xf32> to vector<2x32xf32>
    %585 = vector.extract_strided_slice %583 {offsets = [2, 0], sizes = [2, 32], strides = [1, 1]} : vector<4x32xf32> to vector<2x32xf32>
    %586 = tpu.concatenate %339, %585 in 1 : vector<2x32xf32>, vector<2x32xf32> -> vector<2x64xf32>
    %587 = tpu.concatenate %374, %550 in 1 : vector<2x32xf32>, vector<2x32xf32> -> vector<2x64xf32>
    %588 = tpu.concatenate %409, %515 in 1 : vector<2x32xf32>, vector<2x32xf32> -> vector<2x64xf32>
    %589 = tpu.concatenate %444, %480 in 1 : vector<2x32xf32>, vector<2x32xf32> -> vector<2x64xf32>
    %590 = tpu.concatenate %479, %445 in 1 : vector<2x32xf32>, vector<2x32xf32> -> vector<2x64xf32>
    %591 = tpu.concatenate %514, %410 in 1 : vector<2x32xf32>, vector<2x32xf32> -> vector<2x64xf32>
    %592 = tpu.concatenate %549, %375 in 1 : vector<2x32xf32>, vector<2x32xf32> -> vector<2x64xf32>
    %593 = tpu.concatenate %584, %340 in 1 : vector<2x32xf32>, vector<2x32xf32> -> vector<2x64xf32>
    %594 = tpu.concatenate %586, %587, %588, %589, %590, %591, %592, %593 in 0 : vector<2x64xf32>, vector<2x64xf32>, vector<2x64xf32>, vector<2x64xf32>, vector<2x64xf32>, vector<2x64xf32>, vector<2x64xf32>, vector<2x64xf32> -> vector<16x64xf32>
    %c0_82 = arith.constant 0 : index
    %c0_83 = arith.constant 0 : index
    %595 = vector.load %arg14[%c0_82, %c0_83] : memref<16x64xf32, #tpu.memory_space<vmem>>, vector<16x64xf32>
    tpu.vector_store %arg14[%c0_82, %c0_83], %594 {strides = array<i32>} : memref<16x64xf32, #tpu.memory_space<vmem>>, vector<16x64xf32>,
    %c0_84 = arith.constant 0 : index
    %c0_85 = arith.constant 0 : index
    %596 = vector.load %arg9[%c0_84, %c0_85] : memref<64x32xf32, #tpu.memory_space<vmem>>, vector<64x32xf32>
    %c0_86 = arith.constant 0 : index
    %c0_87 = arith.constant 0 : index
    %597 = vector.load %arg10[%c0_86, %c0_87] : memref<1x32xf32, #tpu.memory_space<vmem>>, vector<1x32xf32>
    %c0_88 = arith.constant 0 : index
    %598 = memref.load %arg0[%c0_88] : memref<2xi32, #tpu.memory_space<smem>>
    %c2_i32 = arith.constant 2 : i32
    %599 = arith.muli %598, %c2_i32 : i32
    %c0_i32 = arith.constant 0 : i32
    %600 = arith.addi %599, %c0_i32 : i32
    %601 = arith.index_cast %600 : i32 to index
    %c0_89 = arith.constant 0 : index
    %602 = vector.load %arg14[%601, %c0_89] : memref<16x64xf32, #tpu.memory_space<vmem>>, vector<1x64xf32>
    %cst_90 = arith.constant dense<0.000000e+00> : vector<1x32xf32>
    %603 = tpu.matmul %602, %596, %cst_90 {dimension_numbers = #tpu.dot_dimension_numbers<[1], [0], [0], [1], [0, 0, 1, 1], [], []>} : vector<1x64xf32>, vector<64x32xf32>, vector<1x32xf32> -> vector<1x32xf32>
    %604 = arith.addf %603, %597 : vector<1x32xf32>
    %cst_91 = arith.constant 0.000000e+00 : f32
    %605 = vector.broadcast %cst_91 : f32 to vector<1x32xf32>
    %606 = arith.maximumf %604, %605 : vector<1x32xf32>
    %c0_92 = arith.constant 0 : index
    %607 = memref.load %arg1[%c0_92] : memref<2xi32, #tpu.memory_space<smem>>
    %608 = arith.index_cast %607 : i32 to index
    %c0_93 = arith.constant 0 : index
    %c0_94 = arith.constant 0 : index
    %609 = vector.load %arg11[%608, %c0_93, %c0_94] : memref<2x32x16xf32, #tpu.memory_space<vmem>>, vector<1x32x16xf32>
    %610 = vector.shape_cast %609 : vector<1x32x16xf32> to vector<32x16xf32>
    %cst_95 = arith.constant dense<0.000000e+00> : vector<1x16xf32>
    %611 = tpu.matmul %606, %610, %cst_95 {dimension_numbers = #tpu.dot_dimension_numbers<[1], [0], [0], [1], [0, 0, 1, 1], [], []>} : vector<1x32xf32>, vector<32x16xf32>, vector<1x16xf32> -> vector<1x16xf32>
    %612 = arith.index_cast %607 : i32 to index
    %c0_96 = arith.constant 0 : index
    %c0_97 = arith.constant 0 : index
    %613 = vector.load %arg12[%612, %c0_96, %c0_97] : memref<2x1x16xf32, #tpu.memory_space<vmem>>, vector<1x1x16xf32>
    %614 = vector.shape_cast %613 : vector<1x1x16xf32> to vector<1x16xf32>
    %615 = arith.addf %611, %614 : vector<1x16xf32>
    %c1 = arith.constant 1 : index
    %616 = memref.load %arg0[%c1] : memref<2xi32, #tpu.memory_space<smem>>
    %c2_i32_98 = arith.constant 2 : i32
    %617 = arith.muli %616, %c2_i32_98 : i32
    %c1_i32 = arith.constant 1 : i32
    %618 = arith.addi %617, %c1_i32 : i32
    %619 = arith.index_cast %618 : i32 to index
    %c0_99 = arith.constant 0 : index
    %620 = vector.load %arg14[%619, %c0_99] : memref<16x64xf32, #tpu.memory_space<vmem>>, vector<1x64xf32>
    %cst_100 = arith.constant dense<0.000000e+00> : vector<1x32xf32>
    %621 = tpu.matmul %620, %596, %cst_100 {dimension_numbers = #tpu.dot_dimension_numbers<[1], [0], [0], [1], [0, 0, 1, 1], [], []>} : vector<1x64xf32>, vector<64x32xf32>, vector<1x32xf32> -> vector<1x32xf32>
    %622 = arith.addf %621, %597 : vector<1x32xf32>
    %cst_101 = arith.constant 0.000000e+00 : f32
    %623 = vector.broadcast %cst_101 : f32 to vector<1x32xf32>
    %624 = arith.maximumf %622, %623 : vector<1x32xf32>
    %c1_102 = arith.constant 1 : index
    %625 = memref.load %arg1[%c1_102] : memref<2xi32, #tpu.memory_space<smem>>
    %626 = arith.index_cast %625 : i32 to index
    %c0_103 = arith.constant 0 : index
    %c0_104 = arith.constant 0 : index
    %627 = vector.load %arg11[%626, %c0_103, %c0_104] : memref<2x32x16xf32, #tpu.memory_space<vmem>>, vector<1x32x16xf32>
    %628 = vector.shape_cast %627 : vector<1x32x16xf32> to vector<32x16xf32>
    %cst_105 = arith.constant dense<0.000000e+00> : vector<1x16xf32>
    %629 = tpu.matmul %624, %628, %cst_105 {dimension_numbers = #tpu.dot_dimension_numbers<[1], [0], [0], [1], [0, 0, 1, 1], [], []>} : vector<1x32xf32>, vector<32x16xf32>, vector<1x16xf32> -> vector<1x16xf32>
    %630 = arith.index_cast %625 : i32 to index
    %c0_106 = arith.constant 0 : index
    %c0_107 = arith.constant 0 : index
    %631 = vector.load %arg12[%630, %c0_106, %c0_107] : memref<2x1x16xf32, #tpu.memory_space<vmem>>, vector<1x1x16xf32>
    %632 = vector.shape_cast %631 : vector<1x1x16xf32> to vector<1x16xf32>
    %633 = arith.addf %629, %632 : vector<1x16xf32>
    %634 = tpu.concatenate %615, %633 in 0 : vector<1x16xf32>, vector<1x16xf32> -> vector<2x16xf32>
    %c0_108 = arith.constant 0 : index
    %c0_109 = arith.constant 0 : index
    %635 = vector.load %arg13[%c0_108, %c0_109] : memref<2x16xf32, #tpu.memory_space<vmem>>, vector<2x16xf32>
    tpu.vector_store %arg13[%c0_108, %c0_109], %634 {strides = array<i32>} : memref<2x16xf32, #tpu.memory_space<vmem>>, vector<2x16xf32>,
    return
  }
}

</mosaic_0001>

<bundles_post_ra>
// kernel: my_lstm_forward.1
= control target key start
LH: loop header
LB: loop body
LE: loop exit
PB: predicated region body
PF: predicated region fallthrough
CT: control target
= control target key end

     0   :  { %18 = vsyncpa [#allocation6], 0  ;;  %s3105_s0 = inlined_call_operand.vmem [shape: s32[2], index: 0, kind: input, shape index: {}]   ;;  %s3106_s1 = inlined_call_operand.vmem [shape: s32[2], index: 1, kind: input, shape index: {}]   ;;  %s3107_s2 = inlined_call_operand.vmem [shape: f32[16,32], index: 2, kind: input, shape index: {}]   ;;  %s3108_s3 = inlined_call_operand.vmem [shape: f32[32,256], index: 3, kind: input, shape index: {}]   ;;  %s3109_s4 = inlined_call_operand.vmem [shape: f32[32,256], index: 4, kind: input, shape index: {}]   ;;  %s3110_s5 = inlined_call_operand.vmem [shape: f32[1,256], index: 5, kind: input, shape index: {}]   ;;  %s3111_s6 = inlined_call_operand.vmem [shape: f32[64,256], index: 6, kind: input, shape index: {}]   ;;  %s3112_s7 = inlined_call_operand.hbm [shape: f32[32,256], index: 7, kind: input, shape index: {}]   ;;  %s3113_s8 = inlined_call_operand.vmem [shape: f32[1,256], index: 8, kind: input, shape index: {}]   ;;  %s3114_s9 = inlined_call_operand.vmem [shape: f32[64,32], index: 9, kind: input, shape index: {}]   ;;  %s3115_s10 = inlined_call_operand.vmem [shape: f32[1,32], index: 10, kind: input, shape index: {}]   ;;  %s3116_s11 = inlined_call_operand.vmem [shape: f32[2,32,16], index: 11, kind: input, shape index: {}]   ;;  %s3117_s12 = inlined_call_operand.vmem [shape: f32[2,1,16], index: 12, kind: input, shape index: {}]   ;;  %s3118_s13 = inlined_call_operand.hbm [shape: f32[2,16], index: 13, kind: output, shape index: {}]  }
   0x1   :  { %19 = vsyncpa [#allocation8], 0 }
   0x2   :  { %20 = vsyncpa [#allocation4], 0 }
   0x3   :  { %21 = vsyncpa [#allocation5], 0  ;;  %s27_s27 = sshll.u32 %s3105_s0, 4  ;;  %s36_s30 = sshll.u32 %s3106_s1, 4  ;;  %s28_s27 = int_to_ptr.vmem [resolvable:$true] %s27_s27  ;;  %s37_s30 = int_to_ptr.vmem [resolvable:$true] %s36_s30 }
   0x4   :  { %s2349_s14 = smov [#allocation3]   ;;  %s2350_s15 = smov [#allocation7]  }
   0x5   :  { %30 = dma.vmem_to_smem %s28_s27, 16, %s2349_s14, [#allocation6]  }
   0x6   :  { %39 = dma.vmem_to_smem %s37_s30, 16, %s2350_s15, [#allocation8]  }
   0x7   :  { %s54_s18 = sshll.u32 %s3112_s7, 4  ;;  %s2351_s19 = smov [#allocation9]   ;;  %s55_s18 = int_to_ptr.hbm [resolvable:$true] %s54_s18 }
   0x8   :  { %s56_s20 = sshll.u32 %s2351_s19, 4  ;;  %s2352_s21 = smov 256   ;;  %s57_s20 = int_to_ptr.vmem [resolvable:$true] %s56_s20 }
   0x9   :  { %s2353_s0 = smov 16  }
   0xa   :  { %62 = dma.hbm_to_vmem [thread:$0]  %s55_s18, 1024, %s57_s20, [#allocation4], %s2352_s21, %s2352_s21, %s2353_s0  }
   0xb   :  { %2341 = dma.done.wait [#allocation6], 16  }
   0xc   :  { %2342 = vsyncadd [#allocation6], 4294967280 }
   0xd   :  { %2343 = dma.done.wait [#allocation8], 16  }
   0xe   :  { %2344 = vsyncadd [#allocation8], 4294967280 }
   0xf   :  { %2345 = dma.done.wait [#allocation4], 1024  }
  0x10   :  { %2346 = vsyncadd [#allocation4], 4294966272 }
  0x11   :  { %85 = sfence }
  0x12   :  { %v94_v0 = vld [vmem:[%s3108_s3 + $0x30] sm:$0xff]  ;;  %v92_v1 = vld [vmem:[%s3108_s3 + $0x20] sm:$0xff]  ;;  %v95_v2 = vld [vmem:[%s3108_s3 + $0x38] sm:$0xff]  ;;  %vm110_vm0 = vcmask 261120   ;;  %v2354_v18 = vmov 0.0   ;;  %vm214_vm1 = vcmask 1041408  }
  0x13   :  { %2128 = vmatpush.msra.mxu3 %v94_v0  ;;  %129 = vmatpush.msra.mxu0 %v94_v0  ;;  %v90_v3 = vld [vmem:[%s3108_s3 + $0x10] sm:$0xff]  ;;  %v93_v4 = vld [vmem:[%s3108_s3 + $0x28] sm:$0xff]  ;;  %v91_v5 = vld [vmem:[%s3108_s3 + $0x18] sm:$0xff]  ;;  %s2356_s18 = smov 32   ;;  %s2121_s7 = sld [smem:[#allocation3 + $0x1]] }
  0x14   :  { %152 = vmatpush.msra.mxu1 %v95_v2  ;;  %v88_v6 = vld [vmem:[%s3108_s3] sm:$0xff]  ;;  %v2461_v7 = vld [vmem:[%s3109_s4 + $0x30] sm:$0xff]  ;;  %v87_v8 = vld [vmem:[%s3107_s2 + $0x8] sm:$0xff]  ;;  %s2042_s21 = sshll.u32 %s3118_s13, 4  ;;  %s2043_s21 = int_to_ptr.hbm [resolvable:$true] %s2042_s21 }
  0x15   :  { %2129 = vmatpush.msra.mxu3 %v92_v1  ;;  %130 = vmatpush.msra.mxu0 %v92_v1  ;;  %v89_v9 = vld [vmem:[%s3108_s3 + $0x8] sm:$0xff]  ;;  %v2473_v10 = vld [vmem:[%s3109_s4 + $0x20] sm:$0xff]  ;;  %v2478_v11 = vld [vmem:[%s3109_s4 + $0x38] sm:$0xff] }
  0x16   :  { %153 = vmatpush.msra.mxu1 %v93_v4  ;;  %178 = vmatpush.msra.mxu2 %v2461_v7  ;;  %v86_v12 = vld [vmem:[%s3107_s2] sm:$0xff]  ;;  %v2487_v13 = vld [vmem:[%s3109_s4 + $0x10] sm:$0xff]  ;;  %v2493_v14 = vld [vmem:[%s3109_s4 + $0x28] sm:$0xff]  ;;  %s3028_s2 = sld [smem:[#allocation7 + $0x1]] }
  0x17   :  { %2130 = vmatpush.msra.mxu3 %v90_v3  ;;  %131 = vmatpush.msra.mxu0 %v90_v3  ;;  %v2500_v15 = vld [vmem:[%s3109_s4] sm:$0xff]  ;;  %v2505_v16 = vld [vmem:[%s3109_s4 + $0x18] sm:$0xff]  ;;  %v2513_v17 = vld [vmem:[%s3109_s4 + $0x8] sm:$0xff]  ;;  %s2357_s4 = smov [#allocation10]  }
  0x18   :  { %154 = vmatpush.msra.mxu1 %v91_v5  ;;  %179 = vmatpush.msra.mxu2 %v2473_v10  ;;  %v104_v19 = vld [vmem:[%s3110_s5] sm:$0x3]  ;;  %s2355_s5 = smov 64   ;;  %s2040_s17 = sshll.u32 %s2357_s4, 4  ;;  %s2041_s17 = int_to_ptr.vmem [resolvable:$true] %s2040_s17 }
  0x19   :  { %2131 = vmatpush.msra.mxu3 %v88_v6  ;;  %132 = vmatpush.msra.mxu0 %v88_v6  ;;  %v107_v20 = vperm.slane %v104_v19, 1  ;;  %v106_v23 = vperm.slane %v104_v19, 0  ;;  %s2122_s25 = sshll.u32 %s2121_s7, 1 }
  0x1a   :  { %2066 = vmatmul.msk.f32.vlgmr.msra.gmra.mxu3 %vm110_vm0, %v87_v8  ;;  %155 = vmatpush.msra.mxu1 %v89_v9  ;;  %s2060_s3 = scalar_lea.vmem [#allocation2], %s2122_s25 }
  0x1b   :  { %198 = vmatpush.msrb.mxu3 %v2478_v11  ;;  %2067 = vmatmul.msk.f32.vlgmr.msra.gmra.mxu1 %vm110_vm0, %v86_v12 }
  0x1c   :  { %180 = vmatpush.msra.mxu2 %v2487_v13  ;;  %2065 = vmatmul.msk.f32.vlgmr.msra.gmra.mxu0 %vm110_vm0, %v86_v12  ;;  %s2126_s20 = sshll.u32 %s3028_s2, 5  ;;  %s2003_s14 = scalar_lea.vmem %s3117_s12, %s3028_s2 }
  0x1d   :  { %199 = vmatpush.msrb.mxu3 %v2493_v14  ;;  %387 = vmatpush.msrb.mxu1 %v2478_v11  ;;  %s3052_s23 = scalar_lea.vmem %s3116_s11, %s2126_s20 }
  0x1e   :  { %181 = vmatpush.msra.mxu2 %v2500_v15  ;;  %367 = vmatpush.msrb.mxu0 %v2461_v7 }
  0x1f   :  { %200 = vmatpush.msrb.mxu3 %v2505_v16  ;;  %182 = vmatmul.f32.vlgmr.msra.gmra.mxu2 %v2354_v18 }
  0x20   :  { %270 = vmatpush.msrb.mxu2 %v2461_v7  ;;  %388 = vmatpush.msrb.mxu1 %v2493_v14 }
  0x21   :  { %201 = vmatpush.msrb.mxu3 %v2513_v17  ;;  %368 = vmatpush.msrb.mxu0 %v2473_v10 }
  0x22   :  { %202 = vmatmul.f32.vlgmr.msrb.gmra.mxu3 %v2354_v18  ;;  %271 = vmatpush.msrb.mxu2 %v2473_v10 }
  0x23   :  { %2068 = vmatmul.msk.f32.gmra.mxu1 %vm110_vm0, %v87_v8  ;;  %290 = vmatpush.msra.mxu3 %v2478_v11 }
  0x24   :  { %272 = vmatpush.msrb.mxu2 %v2487_v13  ;;  %389 = vmatpush.msrb.mxu1 %v2505_v16 }
  0x25   :  { %291 = vmatpush.msra.mxu3 %v2493_v14  ;;  %369 = vmatpush.msrb.mxu0 %v2487_v13 }
  0x26   :  { %273 = vmatpush.msrb.mxu2 %v2500_v15  ;;  %390 = vmatpush.msrb.mxu1 %v2513_v17 }
  0x27   :  { %292 = vmatpush.msra.mxu3 %v2505_v16  ;;  %370 = vmatpush.msrb.mxu0 %v2500_v15 }
  0x28   :  { %458 = vmatpush.msra.mxu2 %v2461_v7  ;;  %575 = vmatpush.msra.mxu1 %v2478_v11 }
  0x29   :  { %293 = vmatpush.msra.mxu3 %v2513_v17  ;;  %555 = vmatpush.msra.mxu0 %v2461_v7 }
  0x2a   :  { %459 = vmatpush.msra.mxu2 %v2473_v10  ;;  %576 = vmatpush.msra.mxu1 %v2493_v14 }
  0x2b   :  { %478 = vmatpush.msrb.mxu3 %v2478_v11  ;;  %556 = vmatpush.msra.mxu0 %v2473_v10 }
  0x2c   :  { %460 = vmatpush.msra.mxu2 %v2487_v13  ;;  %577 = vmatpush.msra.mxu1 %v2505_v16 }
  0x2d   :  { %479 = vmatpush.msrb.mxu3 %v2493_v14  ;;  %557 = vmatpush.msra.mxu0 %v2487_v13 }
  0x2e   :  { %461 = vmatpush.msra.mxu2 %v2500_v15  ;;  %578 = vmatpush.msra.mxu1 %v2513_v17 }
  0x2f   :  { %480 = vmatpush.msrb.mxu3 %v2505_v16  ;;  %558 = vmatpush.msra.mxu0 %v2500_v15 }
  0x31   :  { %481 = vmatpush.msrb.mxu3 %v2513_v17 }
  0x98   :  { %v157_v21 = vpop.f32.mrf.mxu1 }
  0x99   :  { %v2556_v22 = vadd.f32 %v157_v21, %v107_v20  ;;  %v134_v27 = vpop.f32.mrf.mxu0 }
  0x9a   :  { %v2562_v29 = vadd.f32 %v134_v27, %v106_v23 }
  0x9d   :  { %v137_v24 = vpop.f32.mrf.mxu3 }
  0x9e   :  { %v2558_v25 = vadd.f32 %v137_v24, %v106_v23 }
  0xa0   :  { %v160_v26 = vpop.f32.mrf.mxu1 }
  0xa1   :  { %v2560_v28 = vadd.f32 %v160_v26, %v107_v20 }
  0xa2   :  { %v183_v31 = vpop.f32.mrf.mxu2 }
  0xa3   :  { %v206_v34 = vadd.f32 %v183_v31, %v2562_v29 }
  0xa5   :  { %v203_v30 = vpop.f32.mrf.mxu3 }
  0xa6   :  { %v208_v32 = vrot.slane %v203_v30, 4 }
  0xa8   :  { %v210_v33 = vadd.f32 %v208_v32, %v2560_v28 }
  0xaa   :  { %v212_v35 = vrot.slane %v210_v33, 4 }
  0xac   :  { %v215_v36 = vsel %vm214_vm1, %v206_v34, %v212_v35 }
  0xad   :  { %2141 = vtanh.f32 %v215_v36  ;;  %v2069_v38 = vmul.f32 -1.442695, %v215_v36 }
  0xaf   :  { %2143 = vpow2.f32 %v2069_v38 }
  0xb3   :  { %v2142_v37 = vpop.eup %2141 }
  0xb4   :  { %238 = vrot.lane.b32.xlu0 %v2142_v37, %s2355_s5 }
  0xb5   :  { %v2144_v39 = vpop.eup %2143 }
  0xb6   :  { %v219_v40 = vadd.f32 1.0, %v2144_v39 }
  0xb8   :  { %2145 = vrcp.f32 %v219_v40  ;;  %v231_v46 = vand.u32 2147483648, %v219_v40  ;;  %vm225_vm3 = vweird.f32 %v219_v40  ;;  %v229_v47 = vand.u32 2147483647, %v219_v40 }
  0xba   :  { %v232_v49 = vor.u32 1.1754944e-38, %v231_v46  ;;  %vm230_vm5 = vcmp.eq.f32.partialorder %v229_v47, 8.507059e+37 }
  0xbe   :  { %v2146_v41 = vpop.eup %2145 }
  0xbf   :  { %v221_v42 = vmul.f32 %v2146_v41, %v219_v40  ;;  %vm226_vm2 = vweird.f32 %v2146_v41 }
  0xc0   :  { %vm227_vm4 = vmor %vm225_vm3, %vm226_vm2 }
  0xc1   :  { %v222_v43 = vsub.f32 1.0, %v221_v42 }
  0xc3   :  { %v223_v44 = vmul.f32 %v2146_v41, %v222_v43 }
  0xc5   :  { %v224_v45 = vadd.f32 %v2146_v41, %v223_v44 }
  0xc7   :  { %v228_v48 = vsel %vm227_vm4, %v2146_v41, %v224_v45 }
  0xc8   :  { %v233_v51 = vsel %vm230_vm5, %v232_v49, %v228_v48 }
  0xc9   :  { %v236_v53 = vmul.f32 0.0, %v233_v51 }
 0x126   :  { %v239_v50 = vpop.permute.xlu0 %238 }
 0x127   :  { %v241_v52 = vmul.f32 %v239_v50, %v233_v51 }
 0x129   :  { %243 = vrot.lane.b32.xlu0 %v241_v52, %s2356_s18 }
 0x19b   :  { %v244_v54 = vpop.permute.xlu0 %243 }
 0x19c   :  { %v246_v55 = vadd.f32 %v244_v54, %v236_v53 }
 0x19e   :  { %2147 = vtanh.f32 %v246_v55 }
 0x1a4   :  { %v2148_v56 = vpop.eup %2147 }
 0x1a5   :  { %249 = vrot.lane.b32.xlu1 %v2148_v56, %s2355_s5 }
 0x217   :  { %v250_v57 = vpop.permute.xlu1 %249 }
 0x218   :  { %v2570_v58 = vmul.f32 %v250_v57, %v233_v51 }
 0x21a   :  { %254 = vrot.lane.b32.xlu1 %v2570_v58, %s2356_s18 }
 0x28c   :  { %v2574_v59 = vpop.permute.xlu1 %254 }
 0x28d   :  { %2070 = vmatmul.msk.f32.vlgmr.msrb.gmra.mxu2 %vm110_vm0, %v2574_v59  ;;  %2071 = vmatmul.msk.f32.vlgmr.msra.gmra.mxu3 %vm110_vm0, %v2574_v59 }
 0x28e   :  { %646 = vmatpush.msrb.mxu2 %v2461_v7  ;;  %666 = vmatpush.msra.mxu3 %v2478_v11 }
 0x290   :  { %647 = vmatpush.msrb.mxu2 %v2473_v10  ;;  %667 = vmatpush.msra.mxu3 %v2493_v14 }
 0x292   :  { %648 = vmatpush.msrb.mxu2 %v2487_v13  ;;  %668 = vmatpush.msra.mxu3 %v2505_v16 }
 0x294   :  { %649 = vmatpush.msrb.mxu2 %v2500_v15  ;;  %669 = vmatpush.msra.mxu3 %v2513_v17 }
 0x310   :  { %v275_v60 = vpop.f32.mrf.mxu2  ;;  %v295_v61 = vpop.f32.mrf.mxu3 }
 0x311   :  { %v299_v62 = vrot.slane %v275_v60, 6  ;;  %v303_v63 = vrot.slane %v295_v61, 6 }
 0x313   :  { %v301_v0 = vadd.f32 %v299_v62, %v2562_v29  ;;  %v305_v1 = vadd.f32 %v303_v63, %v2560_v28 }
 0x315   :  { %v307_v2 = vrot.slane %v301_v0, 2  ;;  %v310_v3 = vrot.slane %v305_v1, 2 }
 0x317   :  { %v312_v4 = vsel %vm214_vm1, %v307_v2, %v310_v3 }
 0x318   :  { %2149 = vtanh.f32 %v312_v4  ;;  %v2072_v6 = vmul.f32 -1.442695, %v312_v4 }
 0x31a   :  { %2151 = vpow2.f32 %v2072_v6 }
 0x31e   :  { %v2150_v5 = vpop.eup %2149 }
 0x31f   :  { %335 = vrot.lane.b32.xlu2 %v2150_v5, %s2355_s5 }
 0x320   :  { %v2152_v8 = vpop.eup %2151 }
 0x321   :  { %v316_v9 = vadd.f32 1.0, %v2152_v8 }
 0x323   :  { %2153 = vrcp.f32 %v316_v9  ;;  %v328_v24 = vand.u32 2147483648, %v316_v9  ;;  %vm322_vm7 = vweird.f32 %v316_v9  ;;  %v326_v26 = vand.u32 2147483647, %v316_v9 }
 0x325   :  { %v329_v30 = vor.u32 1.1754944e-38, %v328_v24  ;;  %vm327_vm9 = vcmp.eq.f32.partialorder %v326_v26, 8.507059e+37 }
 0x329   :  { %v2154_v12 = vpop.eup %2153 }
 0x32a   :  { %v318_v19 = vmul.f32 %v2154_v12, %v316_v9  ;;  %vm323_vm6 = vweird.f32 %v2154_v12 }
 0x32b   :  { %vm324_vm8 = vmor %vm322_vm7, %vm323_vm6 }
 0x32c   :  { %v319_v20 = vsub.f32 1.0, %v318_v19 }
 0x32e   :  { %v320_v21 = vmul.f32 %v2154_v12, %v319_v20 }
 0x330   :  { %v321_v23 = vadd.f32 %v2154_v12, %v320_v21 }
 0x332   :  { %v325_v27 = vsel %vm324_vm8, %v2154_v12, %v321_v23 }
 0x333   :  { %v330_v32 = vsel %vm327_vm9, %v329_v30, %v325_v27 }
 0x334   :  { %v333_v34 = vmul.f32 %v330_v32, %v246_v55 }
 0x379   :  { %v336_v31 = vpop.permute.xlu2 %335 }
 0x37a   :  { %v338_v33 = vmul.f32 %v336_v31, %v330_v32 }
 0x37c   :  { %340 = vrot.lane.b32.xlu2 %v338_v33, %s2356_s18 }
 0x3d6   :  { %v341_v35 = vpop.permute.xlu2 %340 }
 0x3d7   :  { %v343_v36 = vadd.f32 %v341_v35, %v333_v34 }
 0x3d9   :  { %2155 = vtanh.f32 %v343_v36 }
 0x3df   :  { %v2156_v37 = vpop.eup %2155 }
 0x3e0   :  { %346 = vrot.lane.b32.xlu0 %v2156_v37, %s2355_s5 }
 0x452   :  { %v347_v38 = vpop.permute.xlu0 %346 }
 0x453   :  { %v2594_v39 = vmul.f32 %v347_v38, %v330_v32 }
 0x455   :  { %351 = vrot.lane.b32.xlu1 %v2594_v39, %s2356_s18 }
 0x4c7   :  { %v2598_v40 = vpop.permute.xlu1 %351 }
 0x4c8   :  { %2073 = vmatmul.msk.f32.vlgmr.msrb.gmra.mxu0 %vm110_vm0, %v2598_v40  ;;  %2074 = vmatmul.msk.f32.vlgmr.msrb.gmra.mxu1 %vm110_vm0, %v2598_v40 }
 0x4c9   :  { %743 = vmatpush.msrb.mxu0 %v2461_v7  ;;  %763 = vmatpush.msrb.mxu1 %v2478_v11 }
 0x4cb   :  { %744 = vmatpush.msrb.mxu0 %v2473_v10  ;;  %764 = vmatpush.msrb.mxu1 %v2493_v14 }
 0x4cd   :  { %745 = vmatpush.msrb.mxu0 %v2487_v13  ;;  %765 = vmatpush.msrb.mxu1 %v2505_v16 }
 0x4cf   :  { %746 = vmatpush.msrb.mxu0 %v2500_v15  ;;  %766 = vmatpush.msrb.mxu1 %v2513_v17 }
 0x545   :  { %v372_v41 = vpop.f32.mrf.mxu0  ;;  %v392_v43 = vpop.f32.mrf.mxu1 }
 0x546   :  { %v396_v42 = vrot.slane %v372_v41, 4  ;;  %v399_v46 = vadd.f32 %v392_v43, %v2560_v28 }
 0x548   :  { %v398_v44 = vadd.f32 %v396_v42, %v2562_v29 }
 0x54a   :  { %v401_v45 = vrot.slane %v398_v44, 4 }
 0x54c   :  { %v403_v47 = vsel %vm214_vm1, %v401_v45, %v399_v46 }
 0x54d   :  { %2157 = vtanh.f32 %v403_v47  ;;  %v2075_v49 = vmul.f32 -1.442695, %v403_v47 }
 0x54f   :  { %2159 = vpow2.f32 %v2075_v49 }
 0x553   :  { %v2158_v48 = vpop.eup %2157 }
 0x554   :  { %426 = vrot.lane.b32.xlu2 %v2158_v48, %s2355_s5 }
 0x555   :  { %v2160_v50 = vpop.eup %2159 }
 0x556   :  { %v407_v51 = vadd.f32 1.0, %v2160_v50 }
 0x558   :  { %2161 = vrcp.f32 %v407_v51  ;;  %v419_v57 = vand.u32 2147483648, %v407_v51  ;;  %vm413_vm11 = vweird.f32 %v407_v51  ;;  %v417_v60 = vand.u32 2147483647, %v407_v51 }
 0x55a   :  { %v420_v62 = vor.u32 1.1754944e-38, %v419_v57  ;;  %vm418_vm13 = vcmp.eq.f32.partialorder %v417_v60, 8.507059e+37 }
 0x55e   :  { %v2162_v52 = vpop.eup %2161 }
 0x55f   :  { %v409_v53 = vmul.f32 %v2162_v52, %v407_v51  ;;  %vm414_vm10 = vweird.f32 %v2162_v52 }
 0x560   :  { %vm415_vm12 = vmor %vm413_vm11, %vm414_vm10 }
 0x561   :  { %v410_v54 = vsub.f32 1.0, %v409_v53 }
 0x563   :  { %v411_v55 = vmul.f32 %v2162_v52, %v410_v54 }
 0x565   :  { %v412_v56 = vadd.f32 %v2162_v52, %v411_v55 }
 0x567   :  { %v416_v61 = vsel %vm415_vm12, %v2162_v52, %v412_v56 }
 0x568   :  { %v421_v0 = vsel %vm418_vm13, %v420_v62, %v416_v61 }
 0x569   :  { %v424_v2 = vmul.f32 %v421_v0, %v343_v36 }
 0x5ae   :  { %v427_v63 = vpop.permute.xlu2 %426 }
 0x5af   :  { %v429_v1 = vmul.f32 %v427_v63, %v421_v0 }
 0x5b1   :  { %431 = vrot.lane.b32.xlu0 %v429_v1, %s2356_s18 }
 0x623   :  { %v432_v3 = vpop.permute.xlu0 %431 }
 0x624   :  { %v434_v4 = vadd.f32 %v432_v3, %v424_v2 }
 0x626   :  { %2163 = vtanh.f32 %v434_v4 }
 0x62c   :  { %v2164_v5 = vpop.eup %2163 }
 0x62d   :  { %437 = vrot.lane.b32.xlu1 %v2164_v5, %s2355_s5 }
 0x69f   :  { %v438_v6 = vpop.permute.xlu1 %437 }
 0x6a0   :  { %v2618_v8 = vmul.f32 %v438_v6, %v421_v0 }
 0x6a2   :  { %442 = vrot.lane.b32.xlu2 %v2618_v8, %s2356_s18 }
 0x6fc   :  { %v2622_v9 = vpop.permute.xlu2 %442 }
 0x6fd   :  { %2076 = vmatmul.msk.f32.vlgmr.msra.gmra.mxu2 %vm110_vm0, %v2622_v9  ;;  %2077 = vmatmul.msk.f32.vlgmr.msrb.gmra.mxu3 %vm110_vm0, %v2622_v9 }
 0x6fe   :  { %834 = vmatpush.msra.mxu2 %v2461_v7  ;;  %854 = vmatpush.msrb.mxu3 %v2478_v11 }
 0x700   :  { %835 = vmatpush.msra.mxu2 %v2473_v10  ;;  %855 = vmatpush.msrb.mxu3 %v2493_v14 }
 0x702   :  { %836 = vmatpush.msra.mxu2 %v2487_v13  ;;  %856 = vmatpush.msrb.mxu3 %v2505_v16 }
 0x704   :  { %837 = vmatpush.msra.mxu2 %v2500_v15  ;;  %857 = vmatpush.msrb.mxu3 %v2513_v17 }
 0x780   :  { %v463_v12 = vpop.f32.mrf.mxu2  ;;  %v483_v19 = vpop.f32.mrf.mxu3 }
 0x781   :  { %v487_v20 = vrot.slane %v463_v12, 2  ;;  %v491_v21 = vrot.slane %v483_v19, 2 }
 0x783   :  { %v489_v7 = vadd.f32 %v487_v20, %v2562_v29  ;;  %v493_v11 = vadd.f32 %v491_v21, %v2560_v28 }
 0x785   :  { %v495_v23 = vrot.slane %v489_v7, 6  ;;  %v498_v10 = vrot.slane %v493_v11, 6 }
 0x787   :  { %v500_v14 = vsel %vm214_vm1, %v495_v23, %v498_v10 }
 0x788   :  { %2165 = vtanh.f32 %v500_v14  ;;  %v2078_v16 = vmul.f32 -1.442695, %v500_v14 }
 0x78a   :  { %2167 = vpow2.f32 %v2078_v16 }
 0x78e   :  { %v2166_v13 = vpop.eup %2165 }
 0x78f   :  { %523 = vrot.lane.b32.xlu0 %v2166_v13, %s2355_s5 }
 0x790   :  { %v2168_v15 = vpop.eup %2167 }
 0x791   :  { %v504_v17 = vadd.f32 1.0, %v2168_v15 }
 0x793   :  { %2169 = vrcp.f32 %v504_v17  ;;  %v516_v28 = vand.u32 2147483648, %v504_v17  ;;  %vm510_vm15 = vweird.f32 %v504_v17  ;;  %v514_v31 = vand.u32 2147483647, %v504_v17 }
 0x795   :  { %v517_v33 = vor.u32 1.1754944e-38, %v516_v28  ;;  %vm515_vm3 = vcmp.eq.f32.partialorder %v514_v31, 8.507059e+37 }
 0x799   :  { %v2170_v24 = vpop.eup %2169 }
 0x79a   :  { %v506_v26 = vmul.f32 %v2170_v24, %v504_v17  ;;  %vm511_vm14 = vweird.f32 %v2170_v24 }
 0x79b   :  { %vm512_vm2 = vmor %vm510_vm15, %vm511_vm14 }
 0x79c   :  { %v507_v27 = vsub.f32 1.0, %v506_v26 }
 0x79e   :  { %v508_v30 = vmul.f32 %v2170_v24, %v507_v27 }
 0x7a0   :  { %v509_v29 = vadd.f32 %v2170_v24, %v508_v30 }
 0x7a2   :  { %v513_v32 = vsel %vm512_vm2, %v2170_v24, %v509_v29 }
 0x7a3   :  { %v518_v35 = vsel %vm515_vm3, %v517_v33, %v513_v32 }
 0x7a4   :  { %v521_v37 = vmul.f32 %v518_v35, %v434_v4 }
 0x801   :  { %v524_v34 = vpop.permute.xlu0 %523 }
 0x802   :  { %v526_v36 = vmul.f32 %v524_v34, %v518_v35 }
 0x804   :  { %528 = vrot.lane.b32.xlu1 %v526_v36, %s2356_s18 }
 0x876   :  { %v529_v38 = vpop.permute.xlu1 %528 }
 0x877   :  { %v531_v41 = vadd.f32 %v529_v38, %v521_v37 }
 0x879   :  { %2171 = vtanh.f32 %v531_v41 }
 0x87f   :  { %v2172_v42 = vpop.eup %2171 }
 0x880   :  { %534 = vrot.lane.b32.xlu2 %v2172_v42, %s2355_s5 }
 0x8da   :  { %v535_v43 = vpop.permute.xlu2 %534 }
 0x8db   :  { %v2642_v44 = vmul.f32 %v535_v43, %v518_v35 }
 0x8dd   :  { %539 = vrot.lane.b32.xlu0 %v2642_v44, %s2356_s18 }
 0x94f   :  { %v2646_v45 = vpop.permute.xlu0 %539 }
 0x950   :  { %2079 = vmatmul.msk.f32.vlgmr.msra.gmra.mxu0 %vm110_vm0, %v2646_v45  ;;  %2080 = vmatmul.msk.f32.vlgmr.msra.gmra.mxu1 %vm110_vm0, %v2646_v45 }
 0x9cd   :  { %v580_v46 = vpop.f32.mrf.mxu1  ;;  %v560_v48 = vpop.f32.mrf.mxu0 }
 0x9ce   :  { %v585_v47 = vrot.slane %v580_v46, 4  ;;  %v583_v50 = vadd.f32 %v560_v48, %v2558_v25 }
 0x9d0   :  { %v587_v49 = vadd.f32 %v585_v47, %v2556_v22 }
 0x9d2   :  { %v589_v51 = vrot.slane %v587_v49, 4 }
 0x9d4   :  { %v591_v52 = vsel %vm214_vm1, %v583_v50, %v589_v51 }
 0x9d5   :  { %2173 = vtanh.f32 %v591_v52  ;;  %v2081_v54 = vmul.f32 -1.442695, %v591_v52 }
 0x9d7   :  { %2175 = vpow2.f32 %v2081_v54 }
 0x9db   :  { %v2174_v53 = vpop.eup %2173 }
 0x9dc   :  { %614 = vrot.lane.b32.xlu1 %v2174_v53, %s2355_s5 }
 0x9dd   :  { %v2176_v55 = vpop.eup %2175 }
 0x9de   :  { %v595_v56 = vadd.f32 1.0, %v2176_v55 }
 0x9e0   :  { %2177 = vrcp.f32 %v595_v56  ;;  %v607_v0 = vand.u32 2147483648, %v595_v56  ;;  %vm601_vm5 = vweird.f32 %v595_v56  ;;  %v605_v1 = vand.u32 2147483647, %v595_v56 }
 0x9e2   :  { %v608_v3 = vor.u32 1.1754944e-38, %v607_v0  ;;  %vm606_vm7 = vcmp.eq.f32.partialorder %v605_v1, 8.507059e+37 }
 0x9e6   :  { %v2178_v57 = vpop.eup %2177 }
 0x9e7   :  { %v597_v60 = vmul.f32 %v2178_v57, %v595_v56  ;;  %vm602_vm4 = vweird.f32 %v2178_v57 }
 0x9e8   :  { %vm603_vm6 = vmor %vm601_vm5, %vm602_vm4 }
 0x9e9   :  { %v598_v61 = vsub.f32 1.0, %v597_v60 }
 0x9eb   :  { %v599_v62 = vmul.f32 %v2178_v57, %v598_v61 }
 0x9ed   :  { %v600_v63 = vadd.f32 %v2178_v57, %v599_v62 }
 0x9ef   :  { %v604_v2 = vsel %vm603_vm6, %v2178_v57, %v600_v63  ;;  %vm986_vm6 = vcmask 1045504  }
 0x9f0   :  { %v609_v5 = vsel %vm606_vm7, %v608_v3, %v604_v2  ;;  %vm984_vm7 = vcmask 1043456  }
 0x9f1   :  { %v612_v12 = vmul.f32 %v609_v5, %v531_v41 }
 0xa4e   :  { %v615_v4 = vpop.permute.xlu1 %614 }
 0xa4f   :  { %v617_v6 = vmul.f32 %v615_v4, %v609_v5 }
 0xa51   :  { %619 = vrot.lane.b32.xlu2 %v617_v6, %s2356_s18 }
 0xaab   :  { %v620_v19 = vpop.permute.xlu2 %619 }
 0xaac   :  { %v622_v20 = vadd.f32 %v620_v19, %v612_v12 }
 0xaae   :  { %2179 = vtanh.f32 %v622_v20 }
 0xab4   :  { %v2180_v21 = vpop.eup %2179 }
 0xab5   :  { %625 = vrot.lane.b32.xlu0 %v2180_v21, %s2355_s5 }
 0xb27   :  { %v626_v7 = vpop.permute.xlu0 %625 }
 0xb28   :  { %v2658_v11 = vmul.f32 %v626_v7, %v609_v5 }
 0xb2a   :  { %630 = vrot.lane.b32.xlu1 %v2658_v11, %s2356_s18 }
 0xb9c   :  { %v2662_v23 = vpop.permute.xlu1 %630 }
 0xb9d   :  { %2082 = vmatmul.msk.f32.vlgmr.msrb.gmra.mxu2 %vm110_vm0, %v2662_v23  ;;  %2083 = vmatmul.msk.f32.vlgmr.msra.gmra.mxu3 %vm110_vm0, %v2662_v23 }
 0xc20   :  { %v651_v10 = vpop.f32.mrf.mxu2  ;;  %v671_v14 = vpop.f32.mrf.mxu3 }
 0xc21   :  { %v675_v13 = vrot.slane %v651_v10, 6  ;;  %v679_v16 = vrot.slane %v671_v14, 6 }
 0xc23   :  { %v677_v15 = vadd.f32 %v675_v13, %v2558_v25  ;;  %v681_v17 = vadd.f32 %v679_v16, %v2556_v22 }
 0xc25   :  { %v683_v24 = vrot.slane %v677_v15, 2  ;;  %v686_v26 = vrot.slane %v681_v17, 2 }
 0xc27   :  { %v688_v27 = vsel %vm214_vm1, %v683_v24, %v686_v26 }
 0xc28   :  { %2181 = vtanh.f32 %v688_v27  ;;  %v2084_v29 = vmul.f32 -1.442695, %v688_v27 }
 0xc2a   :  { %2183 = vpow2.f32 %v2084_v29 }
 0xc2e   :  { %v2182_v30 = vpop.eup %2181 }
 0xc2f   :  { %711 = vrot.lane.b32.xlu2 %v2182_v30, %s2355_s5 }
 0xc30   :  { %v2184_v28 = vpop.eup %2183 }
 0xc31   :  { %v692_v31 = vadd.f32 1.0, %v2184_v28 }
 0xc33   :  { %2185 = vrcp.f32 %v692_v31  ;;  %v704_v37 = vand.u32 2147483648, %v692_v31  ;;  %vm698_vm9 = vweird.f32 %v692_v31  ;;  %v702_v38 = vand.u32 2147483647, %v692_v31 }
 0xc35   :  { %v705_v42 = vor.u32 1.1754944e-38, %v704_v37  ;;  %vm703_vm11 = vcmp.eq.f32.partialorder %v702_v38, 8.507059e+37 }
 0xc39   :  { %v2186_v32 = vpop.eup %2185 }
 0xc3a   :  { %v694_v33 = vmul.f32 %v2186_v32, %v692_v31  ;;  %vm699_vm8 = vweird.f32 %v2186_v32 }
 0xc3b   :  { %vm700_vm10 = vmor %vm698_vm9, %vm699_vm8  ;;  %vm1021_vm8 = vcmask 523264  }
 0xc3c   :  { %v695_v34 = vsub.f32 1.0, %v694_v33 }
 0xc3e   :  { %v696_v35 = vmul.f32 %v2186_v32, %v695_v34 }
 0xc40   :  { %v697_v36 = vadd.f32 %v2186_v32, %v696_v35 }
 0xc42   :  { %v701_v41 = vsel %vm700_vm10, %v2186_v32, %v697_v36 }
 0xc43   :  { %v706_v46 = vsel %vm703_vm11, %v705_v42, %v701_v41 }
 0xc44   :  { %v709_v48 = vmul.f32 %v706_v46, %v622_v20 }
 0xc89   :  { %v712_v43 = vpop.permute.xlu2 %711 }
 0xc8a   :  { %v714_v47 = vmul.f32 %v712_v43, %v706_v46  ;;  %v934_v43 = vrot.slane %v2658_v11, 2 }
 0xc8c   :  { %716 = vrot.lane.b32.xlu0 %v714_v47, %s2356_s18 }
 0xcfe   :  { %v717_v49 = vpop.permute.xlu0 %716 }
 0xcff   :  { %v719_v50 = vadd.f32 %v717_v49, %v709_v48 }
 0xd01   :  { %2187 = vtanh.f32 %v719_v50 }
 0xd07   :  { %v2188_v51 = vpop.eup %2187 }
 0xd08   :  { %722 = vrot.lane.b32.xlu1 %v2188_v51, %s2355_s5 }
 0xd7a   :  { %v723_v52 = vpop.permute.xlu1 %722 }
 0xd7b   :  { %v2674_v53 = vmul.f32 %v723_v52, %v706_v46  ;;  %v940_v46 = vrot.slane %v2642_v44, 2 }
 0xd7d   :  { %727 = vrot.lane.b32.xlu2 %v2674_v53, %s2356_s18 }
 0xdd7   :  { %v2678_v54 = vpop.permute.xlu2 %727 }
 0xdd8   :  { %2085 = vmatmul.msk.f32.vlgmr.msrb.gmra.mxu0 %vm110_vm0, %v2678_v54  ;;  %2086 = vmatmul.msk.f32.vlgmr.msrb.gmra.mxu1 %vm110_vm0, %v2678_v54 }
 0xe55   :  { %v748_v55 = vpop.f32.mrf.mxu0  ;;  %v768_v57 = vpop.f32.mrf.mxu1 }
 0xe56   :  { %v772_v56 = vrot.slane %v748_v55, 4  ;;  %v775_v62 = vadd.f32 %v768_v57, %v2556_v22 }
 0xe58   :  { %v774_v60 = vadd.f32 %v772_v56, %v2558_v25 }
 0xe5a   :  { %v777_v61 = vrot.slane %v774_v60, 4 }
 0xe5c   :  { %v779_v63 = vsel %vm214_vm1, %v777_v61, %v775_v62  ;;  %v928_v62 = vrot.slane %v2674_v53, 2 }
 0xe5d   :  { %2189 = vtanh.f32 %v779_v63  ;;  %v2087_v1 = vmul.f32 -1.442695, %v779_v63  ;;  %v946_v63 = vrot.slane %v2618_v8, 2  ;;  %v960_v8 = vrot.slane %v2570_v58, 2  ;;  %v1004_v58 = vld [vmem:[%s3111_s6 + $0x68] sm:$0xff] }
 0xe5f   :  { %2191 = vpow2.f32 %v2087_v1 }
 0xe63   :  { %v2190_v0 = vpop.eup %2189 }
 0xe64   :  { %802 = vrot.lane.b32.xlu0 %v2190_v0, %s2355_s5 }
 0xe65   :  { %v2192_v2 = vpop.eup %2191 }
 0xe66   :  { %v783_v3 = vadd.f32 1.0, %v2192_v2 }
 0xe68   :  { %2193 = vrcp.f32 %v783_v3  ;;  %v795_v20 = vand.u32 2147483648, %v783_v3  ;;  %vm789_vm13 = vweird.f32 %v783_v3  ;;  %v793_v21 = vand.u32 2147483647, %v783_v3 }
 0xe6a   :  { %v796_v10 = vor.u32 1.1754944e-38, %v795_v20  ;;  %vm794_vm15 = vcmp.eq.f32.partialorder %v793_v21, 8.507059e+37  ;;  %v1001_v20 = vld [vmem:[%s3111_s6 + $0x50] sm:$0xff]  ;;  %v1002_v21 = vld [vmem:[%s3111_s6 + $0x58] sm:$0xff] }
 0xe6e   :  { %v2194_v4 = vpop.eup %2193 }
 0xe6f   :  { %v785_v5 = vmul.f32 %v2194_v4, %v783_v3  ;;  %vm790_vm12 = vweird.f32 %v2194_v4 }
 0xe70   :  { %vm791_vm14 = vmor %vm789_vm13, %vm790_vm12 }
 0xe71   :  { %v786_v6 = vsub.f32 1.0, %v785_v5 }
 0xe73   :  { %v787_v12 = vmul.f32 %v2194_v4, %v786_v6 }
 0xe75   :  { %v788_v19 = vadd.f32 %v2194_v4, %v787_v12  ;;  %v1005_v12 = vld [vmem:[%s3111_s6 + $0x70] sm:$0xff] }
 0xe76   :  { %1036 = vmatpush.msra.mxu0 %v1005_v12 }
 0xe77   :  { %v792_v7 = vsel %vm791_vm14, %v2194_v4, %v788_v19  ;;  %v952_v4 = vrot.slane %v2594_v39, 2  ;;  %v1006_v39 = vld [vmem:[%s3111_s6 + $0x78] sm:$0xff]  ;;  %v1003_v19 = vld [vmem:[%s3111_s6 + $0x60] sm:$0xff] }
 0xe78   :  { %v797_v13 = vsel %vm794_vm15, %v796_v10, %v792_v7  ;;  %1059 = vmatpush.msra.mxu1 %v1006_v39  ;;  %v2736_v7 = vld [vmem:[#allocation9 + $0x30] sm:$0xff]  ;;  %1037 = vmatpush.msra.mxu0 %v1003_v19  ;;  %v2738_v10 = vld [vmem:[#allocation9 + $0x20] sm:$0xff] }
 0xe79   :  { %v800_v15 = vmul.f32 %v797_v13, %v719_v50  ;;  %1086 = vmatpush.msrb.mxu2 %v2736_v7 }
 0xe7a   :  { %1060 = vmatpush.msra.mxu1 %v1004_v58  ;;  %1038 = vmatpush.msra.mxu0 %v1001_v20 }
 0xe7b   :  { %1087 = vmatpush.msrb.mxu2 %v2738_v10 }
 0xe7c   :  { %1061 = vmatpush.msra.mxu1 %v1002_v21 }
 0xed6   :  { %v803_v14 = vpop.permute.xlu0 %802 }
 0xed7   :  { %v805_v16 = vmul.f32 %v803_v14, %v797_v13  ;;  %v999_v14 = vld [vmem:[%s3111_s6 + $0x40] sm:$0xff] }
 0xed8   :  { %1039 = vmatpush.msra.mxu0 %v999_v14 }
 0xed9   :  { %807 = vrot.lane.b32.xlu1 %v805_v16, %s2356_s18  ;;  %v2747_v16 = vld [vmem:[#allocation9 + $0x38] sm:$0xff] }
 0xeda   :  { %1106 = vmatpush.msra.mxu3 %v2747_v16 }
 0xf4b   :  { %v808_v17 = vpop.permute.xlu1 %807 }
 0xf4c   :  { %v810_v24 = vadd.f32 %v808_v17, %v800_v15  ;;  %v2749_v15 = vld [vmem:[#allocation9 + $0x10] sm:$0xff]  ;;  %v997_v17 = vld [vmem:[%s3111_s6 + $0x30] sm:$0xff] }
 0xf4d   :  { %1088 = vmatpush.msrb.mxu2 %v2749_v15  ;;  %1040 = vmatpush.msra.mxu0 %v997_v17 }
 0xf4e   :  { %2195 = vtanh.f32 %v810_v24 }
 0xf54   :  { %v2196_v26 = vpop.eup %2195 }
 0xf55   :  { %813 = vrot.lane.b32.xlu2 %v2196_v26, %s2355_s5  ;;  %v2759_v26 = vld [vmem:[#allocation9] sm:$0xff] }
 0xf56   :  { %1089 = vmatpush.msrb.mxu2 %v2759_v26 }
 0xfaf   :  { %v814_v27 = vpop.permute.xlu2 %813 }
 0xfb0   :  { %v816_v30 = vmul.f32 %v814_v27, %v797_v13  ;;  %v1000_v13 = vld [vmem:[%s3111_s6 + $0x48] sm:$0xff]  ;;  %v995_v27 = vld [vmem:[%s3111_s6 + $0x20] sm:$0xff] }
 0xfb1   :  { %1062 = vmatpush.msra.mxu1 %v1000_v13  ;;  %1041 = vmatpush.msra.mxu0 %v995_v27 }
 0xfb2   :  { %818 = vrot.lane.b32.xlu0 %v816_v30, %s2356_s18  ;;  %v922_v42 = vrot.slane %v816_v30, 2  ;;  %v996_v30 = vld [vmem:[%s3111_s6 + $0x28] sm:$0xff] }
0x1024   :  { %v2691_v29 = vpop.permute.xlu0 %818 }
0x1025   :  { %2088 = vmatmul.msk.f32.vlgmr.msra.gmra.mxu2 %vm110_vm0, %v2691_v29  ;;  %2089 = vmatmul.msk.f32.vlgmr.msrb.gmra.mxu3 %vm110_vm0, %v2691_v29 }
0x1026   :  { %1177 = vmatpush.msra.mxu2 %v2736_v7 }
0x1028   :  { %1178 = vmatpush.msra.mxu2 %v2738_v10 }
0x102a   :  { %1179 = vmatpush.msra.mxu2 %v2749_v15 }
0x102c   :  { %1180 = vmatpush.msra.mxu2 %v2759_v26 }
0x102d   :  { %1090 = vmatmul.f32.vlgmr.msrb.gmra.mxu2 %v2354_v18 }
0x102e   :  { %1274 = vmatpush.msrb.mxu2 %v2736_v7 }
0x1030   :  { %1275 = vmatpush.msrb.mxu2 %v2738_v10 }
0x1032   :  { %1276 = vmatpush.msrb.mxu2 %v2749_v15 }
0x1034   :  { %1277 = vmatpush.msrb.mxu2 %v2759_v26 }
0x10a8   :  { %v839_v28 = vpop.f32.mrf.mxu2  ;;  %v859_v31 = vpop.f32.mrf.mxu3 }
0x10a9   :  { %v863_v32 = vrot.slane %v839_v28, 2  ;;  %v867_v33 = vrot.slane %v859_v31, 2  ;;  %v2778_v28 = vld [vmem:[#allocation9 + $0x28] sm:$0xff]  ;;  %v993_v31 = vld [vmem:[%s3111_s6 + $0x10] sm:$0xff] }
0x10aa   :  { %1107 = vmatpush.msra.mxu3 %v2778_v28  ;;  %1042 = vmatpush.msra.mxu0 %v993_v31 }
0x10ab   :  { %v865_v34 = vadd.f32 %v863_v32, %v2558_v25  ;;  %v869_v35 = vadd.f32 %v867_v33, %v2556_v22  ;;  %v994_v32 = vld [vmem:[%s3111_s6 + $0x18] sm:$0xff]  ;;  %v2787_v33 = vld [vmem:[#allocation9 + $0x18] sm:$0xff] }
0x10ac   :  { %1108 = vmatpush.msra.mxu3 %v2787_v33 }
0x10ad   :  { %v871_v36 = vrot.slane %v865_v34, 6  ;;  %v874_v37 = vrot.slane %v869_v35, 6  ;;  %v991_v34 = vld [vmem:[%s3111_s6] sm:$0xff]  ;;  %v992_v35 = vld [vmem:[%s3111_s6 + $0x8] sm:$0xff] }
0x10ae   :  { %1043 = vmatpush.msra.mxu0 %v991_v34 }
0x10af   :  { %v876_v38 = vsel %vm214_vm1, %v871_v36, %v874_v37  ;;  %v2796_v36 = vld [vmem:[#allocation9 + $0x8] sm:$0xff] }
0x10b0   :  { %2197 = vtanh.f32 %v876_v38  ;;  %v2090_v22 = vmul.f32 -1.442695, %v876_v38  ;;  %1365 = vmatpush.msrb.mxu0 %v2736_v7  ;;  %1109 = vmatpush.msra.mxu3 %v2796_v36  ;;  %v1091_v12 = vpop.f32.mrf.mxu2 }
0x10b1   :  { %1110 = vmatmul.f32.vlgmr.msra.gmra.mxu3 %v2354_v18 }
0x10b2   :  { %2199 = vpow2.f32 %v2090_v22  ;;  %1366 = vmatpush.msrb.mxu0 %v2738_v10  ;;  %1197 = vmatpush.msrb.mxu3 %v2747_v16 }
0x10b4   :  { %1367 = vmatpush.msrb.mxu0 %v2749_v15  ;;  %1198 = vmatpush.msrb.mxu3 %v2778_v28 }
0x10b6   :  { %v2198_v41 = vpop.eup %2197  ;;  %1368 = vmatpush.msrb.mxu0 %v2759_v26  ;;  %1199 = vmatpush.msrb.mxu3 %v2787_v33 }
0x10b7   :  { %899 = vrot.lane.b32.xlu1 %v2198_v41, %s2355_s5 }
0x10b8   :  { %v2200_v25 = vpop.eup %2199  ;;  %1200 = vmatpush.msrb.mxu3 %v2796_v36 }
0x10b9   :  { %v880_v47 = vadd.f32 1.0, %v2200_v25 }
0x10ba   :  { %1294 = vmatpush.msra.mxu3 %v2747_v16 }
0x10bb   :  { %2201 = vrcp.f32 %v880_v47  ;;  %v892_v55 = vand.u32 2147483648, %v880_v47  ;;  %vm886_vm3 = vweird.f32 %v880_v47  ;;  %v890_v11 = vand.u32 2147483647, %v880_v47 }
0x10bc   :  { %1295 = vmatpush.msra.mxu3 %v2778_v28 }
0x10bd   :  { %v893_v57 = vor.u32 1.1754944e-38, %v892_v55  ;;  %vm891_vm5 = vcmp.eq.f32.partialorder %v890_v11, 8.507059e+37 }
0x10be   :  { %1296 = vmatpush.msra.mxu3 %v2787_v33 }
0x10bf   :  { %923 = vrot.lane.b32.xlu1 %v922_v42, %s2355_s5 }
0x10c0   :  { %1297 = vmatpush.msra.mxu3 %v2796_v36 }
0x10c1   :  { %v2202_v48 = vpop.eup %2201 }
0x10c2   :  { %v882_v49 = vmul.f32 %v2202_v48, %v880_v47  ;;  %vm887_vm2 = vweird.f32 %v2202_v48 }
0x10c3   :  { %vm888_vm4 = vmor %vm886_vm3, %vm887_vm2 }
0x10c4   :  { %v883_v50 = vsub.f32 1.0, %v882_v49 }
0x10c6   :  { %v884_v51 = vmul.f32 %v2202_v48, %v883_v50 }
0x10c7   :  { %935 = vrot.lane.b32.xlu1 %v934_v43, %s2355_s5 }
0x10c8   :  { %v885_v52 = vadd.f32 %v2202_v48, %v884_v51 }
0x10ca   :  { %v889_v56 = vsel %vm888_vm4, %v2202_v48, %v885_v52 }
0x10cb   :  { %v894_v60 = vsel %vm891_vm5, %v893_v57, %v889_v56 }
0x10cc   :  { %v897_v0 = vmul.f32 %v894_v60, %v810_v24  ;;  %v998_v24 = vld [vmem:[%s3111_s6 + $0x38] sm:$0xff] }
0x10cd   :  { %1063 = vmatpush.msra.mxu1 %v998_v24 }
0x10cf   :  { %941 = vrot.lane.b32.xlu1 %v940_v46, %s2355_s5  ;;  %1064 = vmatpush.msra.mxu1 %v996_v30 }
0x10d1   :  { %1065 = vmatpush.msra.mxu1 %v994_v32 }
0x10d3   :  { %1066 = vmatpush.msra.mxu1 %v992_v35 }
0x10d5   :  { %1385 = vmatpush.msrb.mxu1 %v2747_v16 }
0x10d7   :  { %1386 = vmatpush.msrb.mxu1 %v2778_v28 }
0x10d9   :  { %1387 = vmatpush.msrb.mxu1 %v2787_v33 }
0x10db   :  { %1388 = vmatpush.msrb.mxu1 %v2796_v36 }
0x1129   :  { %v900_v44 = vpop.permute.xlu1 %899 }
0x112a   :  { %v902_v61 = vmul.f32 %v900_v44, %v894_v60 }
0x112c   :  { %904 = vrot.lane.b32.xlu2 %v902_v61, %s2356_s18 }
0x1131   :  { %v924_v18 = vpop.permute.xlu1 %923 }
0x1132   :  { %v926_v42 = vsel %vm110_vm0, %v2598_v40, %v924_v18 }
0x1133   :  { %v966_v22 = vrot.slane %v926_v42, 6 }
0x1134   :  { %929 = vrot.lane.b32.xlu2 %v928_v62, %s2355_s5 }
0x1139   :  { %v936_v41 = vpop.permute.xlu1 %935 }
0x113a   :  { %v938_v46 = vsel %vm110_vm0, %v2646_v45, %v936_v41 }
0x113b   :  { %v972_v50 = vrot.slane %v938_v46, 2 }
0x113c   :  { %947 = vrot.lane.b32.xlu2 %v946_v63, %s2355_s5 }
0x1186   :  { %v905_v1 = vpop.permute.xlu2 %904 }
0x1187   :  { %v907_v2 = vadd.f32 %v905_v1, %v897_v0 }
0x1189   :  { %2203 = vtanh.f32 %v907_v2  ;;  %v1111_v2 = vpop.f32.mrf.mxu3 }
0x118e   :  { %v930_v37 = vpop.permute.xlu2 %929 }
0x118f   :  { %v2204_v3 = vpop.eup %2203  ;;  %v932_v43 = vsel %vm110_vm0, %v2622_v9, %v930_v37 }
0x1190   :  { %910 = vrot.lane.b32.xlu0 %v2204_v3, %s2355_s5  ;;  %v969_v48 = vrot.slane %v932_v43, 4 }
0x1196   :  { %v948_v25 = vpop.permute.xlu2 %947 }
0x1197   :  { %v950_v40 = vsel %vm110_vm0, %v2678_v54, %v948_v25 }
0x1198   :  { %953 = vrot.lane.b32.xlu0 %v952_v4, %s2355_s5  ;;  %v975_v55 = vrot.slane %v950_v40, 6 }
0x1202   :  { %v911_v5 = vpop.permute.xlu0 %910 }
0x1203   :  { %v913_v6 = vmul.f32 %v911_v5, %v894_v60  ;;  %v1116_v5 = vrot.slane %v1111_v2, 4 }
0x1205   :  { %v916_v53 = vrot.slane %v913_v6, 2  ;;  %957 = vrot.lane.b32.xlu2 %v913_v6, %s2356_s18 }
0x1207   :  { %917 = vrot.lane.b32.xlu0 %v916_v53, %s2355_s5 }
0x120a   :  { %v954_v38 = vpop.permute.xlu0 %953 }
0x120b   :  { %v956_v45 = vsel %vm110_vm0, %v2691_v29, %v954_v38 }
0x120c   :  { %v978_v11 = vrot.slane %v956_v45, 4 }
0x120f   :  { %961 = vrot.lane.b32.xlu0 %v960_v8, %s2355_s5 }
0x125f   :  { %v958_v56 = vpop.permute.xlu2 %957 }
0x1279   :  { %v918_v47 = vpop.permute.xlu0 %917 }
0x127a   :  { %v920_v49 = vsel %vm110_vm0, %v2574_v59, %v918_v47  ;;  %v942_v59 = vpop.permute.xlu1 %941 }
0x127b   :  { %v983_v51 = vsel %vm214_vm1, %v920_v49, %v966_v22  ;;  %v944_v29 = vsel %vm110_vm0, %v2662_v23, %v942_v59  ;;  %v2852_v23 = vld [vmem:[%s3113_s8] sm:$0x3]  ;;  %s3080_s8 = sld [smem:[#allocation7]] }
0x127c   :  { %v985_v9 = vsel %vm984_vm7, %v983_v51, %v969_v48  ;;  %v988_v60 = vsel %vm214_vm1, %v944_v29, %v975_v55  ;;  %v1018_v63 = vperm.slane %v2852_v23, 1  ;;  %v1017_v3 = vperm.slane %v2852_v23, 0 }
0x127d   :  { %v987_v52 = vsel %vm986_vm6, %v985_v9, %v972_v50  ;;  %v989_v61 = vsel %vm984_vm7, %v988_v60, %v978_v11 }
0x127e   :  { %2091 = vmatmul.msk.f32.vlgmr.msra.gmra.mxu0 %vm1021_vm8, %v987_v52  ;;  %2093 = vmatmul.msk.f32.vlgmr.msra.gmra.mxu1 %vm1021_vm8, %v987_v52 }
0x127f   :  { %1553 = vmatpush.msra.mxu0 %v2736_v7  ;;  %1573 = vmatpush.msra.mxu1 %v2747_v16 }
0x1281   :  { %v962_v54 = vpop.permute.xlu0 %961  ;;  %1554 = vmatpush.msra.mxu0 %v2738_v10  ;;  %1574 = vmatpush.msra.mxu1 %v2778_v28  ;;  %s2119_s26 = sshll.u32 %s3080_s8, 5 }
0x1282   :  { %v964_v57 = vsel %vm110_vm0, %v958_v56, %v962_v54  ;;  %s1937_s29 = scalar_lea.vmem %s3116_s11, %s2119_s26 }
0x1283   :  { %v981_v44 = vrot.slane %v964_v57, 2  ;;  %1555 = vmatpush.msra.mxu0 %v2749_v15  ;;  %1575 = vmatpush.msra.mxu1 %v2787_v33 }
0x1285   :  { %v990_v62 = vsel %vm986_vm6, %v989_v61, %v981_v44  ;;  %1556 = vmatpush.msra.mxu0 %v2759_v26  ;;  %1576 = vmatpush.msra.mxu1 %v2796_v36 }
0x1286   :  { %2092 = vmatmul.msk.f32.gmra.mxu0 %vm1021_vm8, %v990_v62  ;;  %2094 = vmatmul.msk.f32.gmra.mxu1 %vm1021_vm8, %v990_v62 }
0x12fb   :  { %v1068_v0 = vpop.f32.mrf.mxu1  ;;  %v1045_v4 = vpop.f32.mrf.mxu0 }
0x12fc   :  { %v2855_v1 = vadd.f32 %v1068_v0, %v1018_v63  ;;  %v2860_v53 = vadd.f32 %v1045_v4, %v1017_v3 }
0x12fe   :  { %v1114_v19 = vadd.f32 %v1091_v12, %v2860_v53 }
0x1303   :  { %v1071_v6 = vpop.f32.mrf.mxu1 }
0x1304   :  { %v2862_v8 = vadd.f32 %v1071_v6, %v1018_v63 }
0x1306   :  { %v1118_v39 = vadd.f32 %v1116_v5, %v2862_v8 }
0x1308   :  { %v1120_v58 = vrot.slane %v1118_v39, 4 }
0x130a   :  { %v1122_v20 = vsel %vm214_vm1, %v1114_v19, %v1120_v58 }
0x130b   :  { %2205 = vtanh.f32 %v1122_v20  ;;  %v2095_v14 = vmul.f32 -1.442695, %v1122_v20 }
0x130d   :  { %2207 = vpow2.f32 %v2095_v14 }
0x1311   :  { %v2206_v21 = vpop.eup %2205 }
0x1312   :  { %1145 = vrot.lane.b32.xlu1 %v2206_v21, %s2355_s5 }
0x1313   :  { %v2208_v13 = vpop.eup %2207 }
0x1314   :  { %v1126_v17 = vadd.f32 1.0, %v2208_v13 }
0x1316   :  { %2209 = vrcp.f32 %v1126_v17  ;;  %v1138_v34 = vand.u32 2147483648, %v1126_v17  ;;  %vm1132_vm10 = vweird.f32 %v1126_v17  ;;  %v1136_v35 = vand.u32 2147483647, %v1126_v17 }
0x1318   :  { %v1139_v37 = vor.u32 1.1754944e-38, %v1138_v34  ;;  %vm1137_vm12 = vcmp.eq.f32.partialorder %v1136_v35, 8.507059e+37 }
0x131c   :  { %v2210_v24 = vpop.eup %2209 }
0x131d   :  { %v1128_v27 = vmul.f32 %v2210_v24, %v1126_v17  ;;  %vm1133_vm9 = vweird.f32 %v2210_v24 }
0x131e   :  { %vm1134_vm11 = vmor %vm1132_vm10, %vm1133_vm9 }
0x131f   :  { %v1129_v30 = vsub.f32 1.0, %v1128_v27 }
0x1321   :  { %v1130_v31 = vmul.f32 %v2210_v24, %v1129_v30 }
0x1323   :  { %v1131_v32 = vadd.f32 %v2210_v24, %v1130_v31 }
0x1325   :  { %v1135_v18 = vsel %vm1134_vm11, %v2210_v24, %v1131_v32 }
0x1326   :  { %v1140_v41 = vsel %vm1137_vm12, %v1139_v37, %v1135_v18 }
0x1327   :  { %v1143_v43 = vmul.f32 0.0, %v1140_v41 }
0x1384   :  { %v1146_v38 = vpop.permute.xlu1 %1145 }
0x1385   :  { %v1148_v42 = vmul.f32 %v1146_v38, %v1140_v41 }
0x1387   :  { %1150 = vrot.lane.b32.xlu2 %v1148_v42, %s2356_s18 }
0x13e1   :  { %v1151_v46 = vpop.permute.xlu2 %1150 }
0x13e2   :  { %v1153_v22 = vadd.f32 %v1151_v46, %v1143_v43 }
0x13e4   :  { %2211 = vtanh.f32 %v1153_v22 }
0x13ea   :  { %v2212_v25 = vpop.eup %2211 }
0x13eb   :  { %1156 = vrot.lane.b32.xlu0 %v2212_v25, %s2355_s5 }
0x145d   :  { %v1157_v47 = vpop.permute.xlu0 %1156 }
0x145e   :  { %v2870_v48 = vmul.f32 %v1157_v47, %v1140_v41 }
0x1460   :  { %1161 = vrot.lane.b32.xlu1 %v2870_v48, %s2356_s18 }
0x14d2   :  { %v2874_v49 = vpop.permute.xlu1 %1161 }
0x14d3   :  { %2096 = vmatmul.msk.f32.vlgmr.msra.gmra.mxu2 %vm110_vm0, %v2874_v49  ;;  %2097 = vmatmul.msk.f32.vlgmr.msrb.gmra.mxu3 %vm110_vm0, %v2874_v49 }
0x14d4   :  { %1482 = vmatpush.msrb.mxu3 %v2747_v16  ;;  %1462 = vmatpush.msra.mxu2 %v2736_v7 }
0x14d6   :  { %1483 = vmatpush.msrb.mxu3 %v2778_v28  ;;  %1463 = vmatpush.msra.mxu2 %v2738_v10 }
0x14d8   :  { %1484 = vmatpush.msrb.mxu3 %v2787_v33  ;;  %1464 = vmatpush.msra.mxu2 %v2749_v15 }
0x14da   :  { %1485 = vmatpush.msrb.mxu3 %v2796_v36  ;;  %1465 = vmatpush.msra.mxu2 %v2759_v26 }
0x1556   :  { %v1182_v50 = vpop.f32.mrf.mxu2  ;;  %v1202_v51 = vpop.f32.mrf.mxu3 }
0x1557   :  { %v1206_v40 = vrot.slane %v1182_v50, 6  ;;  %v1210_v9 = vrot.slane %v1202_v51, 6 }
0x1559   :  { %v1208_v45 = vadd.f32 %v1206_v40, %v2860_v53  ;;  %v1212_v52 = vadd.f32 %v1210_v9, %v2862_v8 }
0x155b   :  { %v1214_v59 = vrot.slane %v1208_v45, 2  ;;  %v1217_v55 = vrot.slane %v1212_v52, 2 }
0x155d   :  { %v1219_v11 = vsel %vm214_vm1, %v1214_v59, %v1217_v55 }
0x155e   :  { %2213 = vtanh.f32 %v1219_v11  ;;  %v2098_v54 = vmul.f32 -1.442695, %v1219_v11 }
0x1560   :  { %2215 = vpow2.f32 %v2098_v54 }
0x1564   :  { %v2214_v56 = vpop.eup %2213 }
0x1565   :  { %1242 = vrot.lane.b32.xlu2 %v2214_v56, %s2355_s5 }
0x1566   :  { %v2216_v29 = vpop.eup %2215 }
0x1567   :  { %v1223_v57 = vadd.f32 1.0, %v2216_v29 }
0x1569   :  { %2217 = vrcp.f32 %v1223_v57  ;;  %v1235_v0 = vand.u32 2147483648, %v1223_v57  ;;  %vm1229_vm14 = vweird.f32 %v1223_v57  ;;  %v1233_v2 = vand.u32 2147483647, %v1223_v57 }
0x156b   :  { %v1236_v5 = vor.u32 1.1754944e-38, %v1235_v0  ;;  %vm1234_vm2 = vcmp.eq.f32.partialorder %v1233_v2, 8.507059e+37 }
0x156f   :  { %v2218_v44 = vpop.eup %2217 }
0x1570   :  { %v1225_v60 = vmul.f32 %v2218_v44, %v1223_v57  ;;  %vm1230_vm13 = vweird.f32 %v2218_v44 }
0x1571   :  { %vm1231_vm15 = vmor %vm1229_vm14, %vm1230_vm13 }
0x1572   :  { %v1226_v61 = vsub.f32 1.0, %v1225_v60 }
0x1574   :  { %v1227_v62 = vmul.f32 %v2218_v44, %v1226_v61 }
0x1576   :  { %v1228_v63 = vadd.f32 %v2218_v44, %v1227_v62 }
0x1578   :  { %v1232_v4 = vsel %vm1231_vm15, %v2218_v44, %v1228_v63  ;;  %v1048_v44 = vpop.f32.mrf.mxu0 }
0x1579   :  { %v1237_v12 = vsel %vm1234_vm2, %v1236_v5, %v1232_v4 }
0x157a   :  { %v1240_v19 = vmul.f32 %v1237_v12, %v1153_v22 }
0x15bf   :  { %v1243_v6 = vpop.permute.xlu2 %1242 }
0x15c0   :  { %v1245_v39 = vmul.f32 %v1243_v6, %v1237_v12 }
0x15c2   :  { %1247 = vrot.lane.b32.xlu0 %v1245_v39, %s2356_s18 }
0x1634   :  { %v1248_v58 = vpop.permute.xlu0 %1247 }
0x1635   :  { %v1250_v20 = vadd.f32 %v1248_v58, %v1240_v19 }
0x1637   :  { %2219 = vtanh.f32 %v1250_v20 }
0x163d   :  { %v2220_v21 = vpop.eup %2219 }
0x163e   :  { %1253 = vrot.lane.b32.xlu1 %v2220_v21, %s2355_s5 }
0x16b0   :  { %v1254_v14 = vpop.permute.xlu1 %1253 }
0x16b1   :  { %v2894_v13 = vmul.f32 %v1254_v14, %v1237_v12 }
0x16b3   :  { %1258 = vrot.lane.b32.xlu2 %v2894_v13, %s2356_s18 }
0x170d   :  { %v2898_v17 = vpop.permute.xlu2 %1258 }
0x170e   :  { %2099 = vmatmul.msk.f32.vlgmr.msrb.gmra.mxu2 %vm110_vm0, %v2898_v17  ;;  %2100 = vmatmul.msk.f32.vlgmr.msra.gmra.mxu3 %vm110_vm0, %v2898_v17 }
0x170f   :  { %1650 = vmatpush.msrb.mxu2 %v2736_v7  ;;  %1670 = vmatpush.msra.mxu3 %v2747_v16 }
0x1711   :  { %1651 = vmatpush.msrb.mxu2 %v2738_v10  ;;  %1671 = vmatpush.msra.mxu3 %v2778_v28 }
0x1713   :  { %1652 = vmatpush.msrb.mxu2 %v2749_v15  ;;  %1672 = vmatpush.msra.mxu3 %v2787_v33 }
0x1715   :  { %1653 = vmatpush.msrb.mxu2 %v2759_v26  ;;  %1673 = vmatpush.msra.mxu3 %v2796_v36 }
0x1791   :  { %v1279_v24 = vpop.f32.mrf.mxu2  ;;  %v1299_v30 = vpop.f32.mrf.mxu3 }
0x1792   :  { %v1303_v27 = vrot.slane %v1279_v24, 4  ;;  %v1306_v34 = vadd.f32 %v1299_v30, %v2862_v8 }
0x1794   :  { %v1305_v31 = vadd.f32 %v1303_v27, %v2860_v53 }
0x1796   :  { %v1308_v32 = vrot.slane %v1305_v31, 4 }
0x1798   :  { %v1310_v35 = vsel %vm214_vm1, %v1308_v32, %v1306_v34 }
0x1799   :  { %2221 = vtanh.f32 %v1310_v35  ;;  %v2101_v37 = vmul.f32 -1.442695, %v1310_v35 }
0x179b   :  { %2223 = vpow2.f32 %v2101_v37 }
0x179f   :  { %v2222_v18 = vpop.eup %2221 }
0x17a0   :  { %1333 = vrot.lane.b32.xlu0 %v2222_v18, %s2355_s5 }
0x17a1   :  { %v2224_v38 = vpop.eup %2223 }
0x17a2   :  { %v1314_v41 = vadd.f32 1.0, %v2224_v38  ;;  %v2954_v38 = vadd.f32 %v1048_v44, %v1017_v3 }
0x17a4   :  { %2225 = vrcp.f32 %v1314_v41  ;;  %v1326_v47 = vand.u32 2147483648, %v1314_v41  ;;  %vm1320_vm4 = vweird.f32 %v1314_v41  ;;  %v1324_v50 = vand.u32 2147483647, %v1314_v41 }
0x17a6   :  { %v1327_v40 = vor.u32 1.1754944e-38, %v1326_v47  ;;  %vm1325_vm9 = vcmp.eq.f32.partialorder %v1324_v50, 8.507059e+37 }
0x17aa   :  { %v2226_v42 = vpop.eup %2225 }
0x17ab   :  { %v1316_v43 = vmul.f32 %v2226_v42, %v1314_v41  ;;  %vm1321_vm3 = vweird.f32 %v2226_v42 }
0x17ac   :  { %vm1322_vm5 = vmor %vm1320_vm4, %vm1321_vm3 }
0x17ad   :  { %v1317_v46 = vsub.f32 1.0, %v1316_v43 }
0x17af   :  { %v1318_v22 = vmul.f32 %v2226_v42, %v1317_v46 }
0x17b1   :  { %v1319_v25 = vadd.f32 %v2226_v42, %v1318_v22 }
0x17b3   :  { %v1323_v51 = vsel %vm1322_vm5, %v2226_v42, %v1319_v25 }
0x17b4   :  { %v1328_v45 = vsel %vm1325_vm9, %v1327_v40, %v1323_v51 }
0x17b5   :  { %v1331_v59 = vmul.f32 %v1328_v45, %v1250_v20 }
0x1812   :  { %v1334_v9 = vpop.permute.xlu0 %1333 }
0x1813   :  { %v1336_v52 = vmul.f32 %v1334_v9, %v1328_v45 }
0x1815   :  { %1338 = vrot.lane.b32.xlu1 %v1336_v52, %s2356_s18 }
0x1887   :  { %v1339_v55 = vpop.permute.xlu1 %1338 }
0x1888   :  { %v1341_v11 = vadd.f32 %v1339_v55, %v1331_v59 }
0x188a   :  { %2227 = vtanh.f32 %v1341_v11 }
0x1890   :  { %v2228_v56 = vpop.eup %2227 }
0x1891   :  { %1344 = vrot.lane.b32.xlu2 %v2228_v56, %s2355_s5 }
0x18eb   :  { %v1345_v54 = vpop.permute.xlu2 %1344 }
0x18ec   :  { %v2918_v29 = vmul.f32 %v1345_v54, %v1328_v45 }
0x18ee   :  { %1349 = vrot.lane.b32.xlu0 %v2918_v29, %s2356_s18 }
0x1960   :  { %v2922_v57 = vpop.permute.xlu0 %1349 }
0x1961   :  { %2102 = vmatmul.msk.f32.vlgmr.msrb.gmra.mxu0 %vm110_vm0, %v2922_v57  ;;  %2103 = vmatmul.msk.f32.vlgmr.msrb.gmra.mxu1 %vm110_vm0, %v2922_v57 }
0x1962   :  { %1741 = vmatpush.msrb.mxu0 %v2736_v7  ;;  %1761 = vmatpush.msrb.mxu1 %v2747_v16 }
0x1964   :  { %1742 = vmatpush.msrb.mxu0 %v2738_v10  ;;  %1762 = vmatpush.msrb.mxu1 %v2778_v28 }
0x1966   :  { %1743 = vmatpush.msrb.mxu0 %v2749_v15  ;;  %1763 = vmatpush.msrb.mxu1 %v2787_v33 }
0x1968   :  { %1744 = vmatpush.msrb.mxu0 %v2759_v26  ;;  %1764 = vmatpush.msrb.mxu1 %v2796_v36 }
0x19de   :  { %v1370_v60 = vpop.f32.mrf.mxu0  ;;  %v1390_v61 = vpop.f32.mrf.mxu1 }
0x19df   :  { %v1394_v62 = vrot.slane %v1370_v60, 2  ;;  %v1398_v63 = vrot.slane %v1390_v61, 2 }
0x19e1   :  { %v1396_v7 = vadd.f32 %v1394_v62, %v2860_v53  ;;  %v1400_v16 = vadd.f32 %v1398_v63, %v2862_v8 }
0x19e3   :  { %v1402_v10 = vrot.slane %v1396_v7, 6  ;;  %v1405_v0 = vrot.slane %v1400_v16, 6 }
0x19e5   :  { %v1407_v28 = vsel %vm214_vm1, %v1402_v10, %v1405_v0 }
0x19e6   :  { %2229 = vtanh.f32 %v1407_v28  ;;  %v2104_v26 = vmul.f32 -1.442695, %v1407_v28 }
0x19e8   :  { %2231 = vpow2.f32 %v2104_v26 }
0x19ec   :  { %v2230_v15 = vpop.eup %2229 }
0x19ed   :  { %1430 = vrot.lane.b32.xlu1 %v2230_v15, %s2355_s5 }
0x19ee   :  { %v2232_v33 = vpop.eup %2231 }
0x19ef   :  { %v1411_v36 = vadd.f32 1.0, %v2232_v33 }
0x19f1   :  { %2233 = vrcp.f32 %v1411_v36  ;;  %v1423_v8 = vand.u32 2147483648, %v1411_v36  ;;  %vm1417_vm11 = vweird.f32 %v1411_v36  ;;  %v1421_v12 = vand.u32 2147483647, %v1411_v36 }
0x19f3   :  { %v1424_v19 = vor.u32 1.1754944e-38, %v1423_v8  ;;  %vm1422_vm13 = vcmp.eq.f32.partialorder %v1421_v12, 8.507059e+37 }
0x19f7   :  { %v2234_v2 = vpop.eup %2233 }
0x19f8   :  { %v1413_v4 = vmul.f32 %v2234_v2, %v1411_v36  ;;  %vm1418_vm10 = vweird.f32 %v2234_v2 }
0x19f9   :  { %vm1419_vm12 = vmor %vm1417_vm11, %vm1418_vm10 }
0x19fa   :  { %v1414_v5 = vsub.f32 1.0, %v1413_v4 }
0x19fc   :  { %v1415_v6 = vmul.f32 %v2234_v2, %v1414_v5 }
0x19fe   :  { %v1416_v53 = vadd.f32 %v2234_v2, %v1415_v6 }
0x1a00   :  { %v1420_v39 = vsel %vm1419_vm12, %v2234_v2, %v1416_v53 }
0x1a01   :  { %v1425_v20 = vsel %vm1422_vm13, %v1424_v19, %v1420_v39 }
0x1a02   :  { %v1428_v14 = vmul.f32 %v1425_v20, %v1341_v11 }
0x1a5f   :  { %v1431_v58 = vpop.permute.xlu1 %1430 }
0x1a60   :  { %v1433_v21 = vmul.f32 %v1431_v58, %v1425_v20 }
0x1a62   :  { %1435 = vrot.lane.b32.xlu2 %v1433_v21, %s2356_s18 }
0x1abc   :  { %v1436_v24 = vpop.permute.xlu2 %1435 }
0x1abd   :  { %v1438_v27 = vadd.f32 %v1436_v24, %v1428_v14 }
0x1abf   :  { %2235 = vtanh.f32 %v1438_v27 }
0x1ac5   :  { %v2236_v30 = vpop.eup %2235 }
0x1ac6   :  { %1441 = vrot.lane.b32.xlu0 %v2236_v30, %s2355_s5 }
0x1b38   :  { %v1442_v31 = vpop.permute.xlu0 %1441 }
0x1b39   :  { %v2942_v32 = vmul.f32 %v1442_v31, %v1425_v20 }
0x1b3b   :  { %1446 = vrot.lane.b32.xlu1 %v2942_v32, %s2356_s18 }
0x1bad   :  { %v2946_v34 = vpop.permute.xlu1 %1446 }
0x1bae   :  { %2105 = vmatmul.msk.f32.vlgmr.msra.gmra.mxu2 %vm110_vm0, %v2946_v34  ;;  %2106 = vmatmul.msk.f32.vlgmr.msrb.gmra.mxu3 %vm110_vm0, %v2946_v34 }
0x1c31   :  { %v1487_v35 = vpop.f32.mrf.mxu3  ;;  %v1467_v37 = vpop.f32.mrf.mxu2 }
0x1c32   :  { %v1492_v18 = vrot.slane %v1487_v35, 4  ;;  %v1490_v42 = vadd.f32 %v1467_v37, %v2954_v38 }
0x1c34   :  { %v1494_v41 = vadd.f32 %v1492_v18, %v2855_v1 }
0x1c36   :  { %v1496_v43 = vrot.slane %v1494_v41, 4 }
0x1c38   :  { %v1498_v46 = vsel %vm214_vm1, %v1490_v42, %v1496_v43 }
0x1c39   :  { %2237 = vtanh.f32 %v1498_v46  ;;  %v2107_v25 = vmul.f32 -1.442695, %v1498_v46 }
0x1c3b   :  { %2239 = vpow2.f32 %v2107_v25 }
0x1c3f   :  { %v2238_v22 = vpop.eup %2237 }
0x1c40   :  { %1521 = vrot.lane.b32.xlu2 %v2238_v22, %s2355_s5 }
0x1c41   :  { %v2240_v47 = vpop.eup %2239 }
0x1c42   :  { %v1502_v50 = vadd.f32 1.0, %v2240_v47 }
0x1c44   :  { %2241 = vrcp.f32 %v1502_v50  ;;  %v1514_v45 = vand.u32 2147483648, %v1502_v50  ;;  %vm1508_vm15 = vweird.f32 %v1502_v50  ;;  %v1512_v52 = vand.u32 2147483647, %v1502_v50 }
0x1c46   :  { %v1515_v55 = vor.u32 1.1754944e-38, %v1514_v45  ;;  %vm1513_vm3 = vcmp.eq.f32.partialorder %v1512_v52, 8.507059e+37 }
0x1c4a   :  { %v2242_v51 = vpop.eup %2241 }
0x1c4b   :  { %v1504_v23 = vmul.f32 %v2242_v51, %v1502_v50  ;;  %vm1509_vm14 = vweird.f32 %v2242_v51 }
0x1c4c   :  { %vm1510_vm2 = vmor %vm1508_vm15, %vm1509_vm14 }
0x1c4d   :  { %v1505_v3 = vsub.f32 1.0, %v1504_v23 }
0x1c4f   :  { %v1506_v40 = vmul.f32 %v2242_v51, %v1505_v3 }
0x1c51   :  { %v1507_v9 = vadd.f32 %v2242_v51, %v1506_v40 }
0x1c53   :  { %v1511_v59 = vsel %vm1510_vm2, %v2242_v51, %v1507_v9 }
0x1c54   :  { %v1516_v56 = vsel %vm1513_vm3, %v1515_v55, %v1511_v59 }
0x1c55   :  { %v1519_v44 = vmul.f32 %v1516_v56, %v1438_v27 }
0x1c9a   :  { %v1522_v11 = vpop.permute.xlu2 %1521 }
0x1c9b   :  { %v1524_v54 = vmul.f32 %v1522_v11, %v1516_v56 }
0x1c9d   :  { %1526 = vrot.lane.b32.xlu0 %v1524_v54, %s2356_s18 }
0x1d0f   :  { %v1527_v60 = vpop.permute.xlu0 %1526 }
0x1d10   :  { %v1529_v61 = vadd.f32 %v1527_v60, %v1519_v44 }
0x1d12   :  { %2243 = vtanh.f32 %v1529_v61 }
0x1d18   :  { %v2244_v62 = vpop.eup %2243 }
0x1d19   :  { %1532 = vrot.lane.b32.xlu1 %v2244_v62, %s2355_s5 }
0x1d8b   :  { %v1533_v63 = vpop.permute.xlu1 %1532 }
0x1d8c   :  { %v2962_v7 = vmul.f32 %v1533_v63, %v1516_v56 }
0x1d8e   :  { %1537 = vrot.lane.b32.xlu2 %v2962_v7, %s2356_s18 }
0x1de8   :  { %v2966_v16 = vpop.permute.xlu2 %1537 }
0x1de9   :  { %2108 = vmatmul.msk.f32.vlgmr.msra.gmra.mxu0 %vm110_vm0, %v2966_v16  ;;  %2109 = vmatmul.msk.f32.vlgmr.msra.gmra.mxu1 %vm110_vm0, %v2966_v16 }
0x1e66   :  { %v1558_v10 = vpop.f32.mrf.mxu0  ;;  %v1578_v0 = vpop.f32.mrf.mxu1 }
0x1e67   :  { %v1582_v28 = vrot.slane %v1558_v10, 6  ;;  %v1586_v15 = vrot.slane %v1578_v0, 6 }
0x1e69   :  { %v1584_v26 = vadd.f32 %v1582_v28, %v2954_v38  ;;  %v1588_v33 = vadd.f32 %v1586_v15, %v2855_v1 }
0x1e6b   :  { %v1590_v36 = vrot.slane %v1584_v26, 2  ;;  %v1593_v2 = vrot.slane %v1588_v33, 2 }
0x1e6d   :  { %v1595_v4 = vsel %vm214_vm1, %v1590_v36, %v1593_v2 }
0x1e6e   :  { %2245 = vtanh.f32 %v1595_v4  ;;  %v2110_v6 = vmul.f32 -1.442695, %v1595_v4 }
0x1e70   :  { %2247 = vpow2.f32 %v2110_v6 }
0x1e74   :  { %v2246_v5 = vpop.eup %2245 }
0x1e75   :  { %1618 = vrot.lane.b32.xlu0 %v2246_v5, %s2355_s5 }
0x1e76   :  { %v2248_v53 = vpop.eup %2247 }
0x1e77   :  { %v1599_v8 = vadd.f32 1.0, %v2248_v53 }
0x1e79   :  { %2249 = vrcp.f32 %v1599_v8  ;;  %v1611_v21 = vand.u32 2147483648, %v1599_v8  ;;  %vm1605_vm5 = vweird.f32 %v1599_v8  ;;  %v1609_v14 = vand.u32 2147483647, %v1599_v8 }
0x1e7b   :  { %v1612_v27 = vor.u32 1.1754944e-38, %v1611_v21  ;;  %vm1610_vm10 = vcmp.eq.f32.partialorder %v1609_v14, 8.507059e+37 }
0x1e7f   :  { %v2250_v12 = vpop.eup %2249 }
0x1e80   :  { %v1601_v39 = vmul.f32 %v2250_v12, %v1599_v8  ;;  %vm1606_vm4 = vweird.f32 %v2250_v12 }
0x1e81   :  { %vm1607_vm9 = vmor %vm1605_vm5, %vm1606_vm4 }
0x1e82   :  { %v1602_v19 = vsub.f32 1.0, %v1601_v39 }
0x1e84   :  { %v1603_v58 = vmul.f32 %v2250_v12, %v1602_v19 }
0x1e86   :  { %v1604_v20 = vadd.f32 %v2250_v12, %v1603_v58 }
0x1e88   :  { %v1608_v24 = vsel %vm1607_vm9, %v2250_v12, %v1604_v20 }
0x1e89   :  { %v1613_v31 = vsel %vm1610_vm10, %v1612_v27, %v1608_v24  ;;  %v1859_v27 = vrot.slane %v2894_v13, 2 }
0x1e8a   :  { %v1616_v18 = vmul.f32 %v1613_v31, %v1529_v61 }
0x1ee7   :  { %v1619_v30 = vpop.permute.xlu0 %1618 }
0x1ee8   :  { %v1621_v35 = vmul.f32 %v1619_v30, %v1613_v31  ;;  %v1847_v30 = vrot.slane %v2942_v32, 2 }
0x1eea   :  { %1623 = vrot.lane.b32.xlu1 %v1621_v35, %s2356_s18 }
0x1f5c   :  { %v1624_v37 = vpop.permute.xlu1 %1623 }
0x1f5d   :  { %v1626_v41 = vadd.f32 %v1624_v37, %v1616_v18 }
0x1f5f   :  { %2251 = vtanh.f32 %v1626_v41 }
0x1f65   :  { %v2252_v42 = vpop.eup %2251 }
0x1f66   :  { %1629 = vrot.lane.b32.xlu2 %v2252_v42, %s2355_s5 }
0x1fc0   :  { %v1630_v43 = vpop.permute.xlu2 %1629 }
0x1fc1   :  { %v2978_v46 = vmul.f32 %v1630_v43, %v1613_v31 }
0x1fc3   :  { %1634 = vrot.lane.b32.xlu0 %v2978_v46, %s2356_s18 }
0x2035   :  { %v2982_v22 = vpop.permute.xlu0 %1634 }
0x2036   :  { %2111 = vmatmul.msk.f32.vlgmr.msrb.gmra.mxu2 %vm110_vm0, %v2982_v22  ;;  %2112 = vmatmul.msk.f32.vlgmr.msra.gmra.mxu3 %vm110_vm0, %v2982_v22 }
0x20b9   :  { %v1655_v25 = vpop.f32.mrf.mxu2  ;;  %v1675_v50 = vpop.f32.mrf.mxu3 }
0x20ba   :  { %v1679_v47 = vrot.slane %v1655_v25, 4  ;;  %v1682_v3 = vadd.f32 %v1675_v50, %v2855_v1 }
0x20bc   :  { %v1681_v51 = vadd.f32 %v1679_v47, %v2954_v38 }
0x20be   :  { %v1684_v23 = vrot.slane %v1681_v51, 4 }
0x20c0   :  { %v1686_v40 = vsel %vm214_vm1, %v1684_v23, %v1682_v3  ;;  %v1853_v23 = vrot.slane %v2918_v29, 2 }
0x20c1   :  { %2253 = vtanh.f32 %v1686_v40  ;;  %v2113_v45 = vmul.f32 -1.442695, %v1686_v40 }
0x20c3   :  { %2255 = vpow2.f32 %v2113_v45 }
0x20c7   :  { %v2254_v9 = vpop.eup %2253 }
0x20c8   :  { %1709 = vrot.lane.b32.xlu1 %v2254_v9, %s2355_s5 }
0x20c9   :  { %v2256_v52 = vpop.eup %2255 }
0x20ca   :  { %v1690_v59 = vadd.f32 1.0, %v2256_v52  ;;  %v1835_v52 = vrot.slane %v2978_v46, 2  ;;  %v1905_v46 = vld [vmem:[%s3114_s9 + $0x38] sm:$0xff] }
0x20cb   :  { %1922 = vmatpush.msra.mxu2 %v1905_v46  ;;  %1983 = vmatpush.msra.mxu0 %v1905_v46 }
0x20cc   :  { %2257 = vrcp.f32 %v1690_v59  ;;  %v1702_v60 = vand.u32 2147483648, %v1690_v59  ;;  %vm1696_vm12 = vweird.f32 %v1690_v59  ;;  %v1700_v61 = vand.u32 2147483647, %v1690_v59 }
0x20ce   :  { %v1703_v63 = vor.u32 1.1754944e-38, %v1702_v60  ;;  %vm1701_vm14 = vcmp.eq.f32.partialorder %v1700_v61, 8.507059e+37  ;;  %v1900_v60 = vld [vmem:[%s3114_s9 + $0x10] sm:$0xff]  ;;  %v1899_v61 = vld [vmem:[%s3114_s9 + $0x8] sm:$0xff] }
0x20d2   :  { %v2258_v55 = vpop.eup %2257 }
0x20d3   :  { %v1692_v11 = vmul.f32 %v2258_v55, %v1690_v59  ;;  %vm1697_vm11 = vweird.f32 %v2258_v55  ;;  %v1841_v59 = vrot.slane %v2962_v7, 2  ;;  %v1904_v7 = vld [vmem:[%s3114_s9 + $0x30] sm:$0xff] }
0x20d4   :  { %vm1698_vm13 = vmor %vm1696_vm12, %vm1697_vm11  ;;  %1923 = vmatpush.msra.mxu2 %v1904_v7  ;;  %1984 = vmatpush.msra.mxu0 %v1904_v7 }
0x20d5   :  { %v1693_v56 = vsub.f32 1.0, %v1692_v11 }
0x20d7   :  { %v1694_v54 = vmul.f32 %v2258_v55, %v1693_v56 }
0x20d9   :  { %v1695_v44 = vadd.f32 %v2258_v55, %v1694_v54  ;;  %v1902_v54 = vld [vmem:[%s3114_s9 + $0x20] sm:$0xff] }
0x20db   :  { %v1699_v62 = vsel %vm1698_vm13, %v2258_v55, %v1695_v44  ;;  %v1867_v55 = vrot.slane %v2870_v48, 2  ;;  %v1903_v48 = vld [vmem:[%s3114_s9 + $0x28] sm:$0xff]  ;;  %v1901_v44 = vld [vmem:[%s3114_s9 + $0x18] sm:$0xff] }
0x20dc   :  { %v1704_v0 = vsel %vm1701_vm14, %v1703_v63, %v1699_v62  ;;  %1924 = vmatpush.msra.mxu2 %v1903_v48  ;;  %1985 = vmatpush.msra.mxu0 %v1903_v48  ;;  %v1898_v63 = vld [vmem:[%s3114_s9] sm:$0xff]  ;;  %s1907_s9 = sld [smem:[#allocation3]] }
0x20dd   :  { %v1707_v15 = vmul.f32 %v1704_v0, %v1626_v41 }
0x20de   :  { %1925 = vmatpush.msra.mxu2 %v1902_v54  ;;  %1986 = vmatpush.msra.mxu0 %v1902_v54 }
0x20e0   :  { %1926 = vmatpush.msra.mxu2 %v1901_v44  ;;  %1987 = vmatpush.msra.mxu0 %v1901_v44 }
0x20e2   :  { %1927 = vmatpush.msra.mxu2 %v1900_v60  ;;  %1988 = vmatpush.msra.mxu0 %v1900_v60  ;;  %s2117_s24 = sshll.u32 %s1907_s9, 1 }
0x20e3   :  { %s1909_s6 = scalar_lea.vmem [#allocation2], %s2117_s24 }
0x20e4   :  { %1928 = vmatpush.msra.mxu2 %v1899_v61  ;;  %1989 = vmatpush.msra.mxu0 %v1899_v61 }
0x20e6   :  { %1929 = vmatpush.msra.mxu2 %v1898_v63  ;;  %1990 = vmatpush.msra.mxu0 %v1898_v63 }
0x213a   :  { %v1710_v10 = vpop.permute.xlu1 %1709 }
0x213b   :  { %v1712_v28 = vmul.f32 %v1710_v10, %v1704_v0 }
0x213d   :  { %1714 = vrot.lane.b32.xlu2 %v1712_v28, %s2356_s18 }
0x2197   :  { %v1715_v26 = vpop.permute.xlu2 %1714 }
0x2198   :  { %v1717_v33 = vadd.f32 %v1715_v26, %v1707_v15 }
0x219a   :  { %2259 = vtanh.f32 %v1717_v33 }
0x21a0   :  { %v2260_v36 = vpop.eup %2259 }
0x21a1   :  { %1720 = vrot.lane.b32.xlu0 %v2260_v36, %s2355_s5 }
0x2213   :  { %v1721_v2 = vpop.permute.xlu0 %1720 }
0x2214   :  { %v1723_v4 = vmul.f32 %v1721_v2, %v1704_v0  ;;  %v2002_v0 = vld [vmem:[%s3052_s23 + $0x18] sm:$0xff] }
0x2215   :  { %2020 = vmatpush.msra.mxu1 %v2002_v0 }
0x2216   :  { %1725 = vrot.lane.b32.xlu1 %v1723_v4, %s2356_s18  ;;  %v1829_v24 = vrot.slane %v1723_v4, 2 }
0x2288   :  { %v2995_v5 = vpop.permute.xlu1 %1725 }
0x2289   :  { %2114 = vmatmul.msk.f32.vlgmr.msrb.gmra.mxu0 %vm110_vm0, %v2995_v5  ;;  %2115 = vmatmul.msk.f32.vlgmr.msrb.gmra.mxu1 %vm110_vm0, %v2995_v5 }
0x2306   :  { %v1746_v6 = vpop.f32.mrf.mxu0  ;;  %v1766_v53 = vpop.f32.mrf.mxu1 }
0x2307   :  { %v1770_v8 = vrot.slane %v1746_v6, 2  ;;  %v1774_v12 = vrot.slane %v1766_v53, 2 }
0x2309   :  { %v1772_v39 = vadd.f32 %v1770_v8, %v2954_v38  ;;  %v1776_v19 = vadd.f32 %v1774_v12, %v2855_v1 }
0x230b   :  { %v1778_v58 = vrot.slane %v1772_v39, 6  ;;  %v1781_v20 = vrot.slane %v1776_v19, 6 }
0x230d   :  { %v1783_v21 = vsel %vm214_vm1, %v1778_v58, %v1781_v20 }
0x230e   :  { %2261 = vtanh.f32 %v1783_v21  ;;  %v2116_v1 = vmul.f32 -1.442695, %v1783_v21 }
0x2310   :  { %2263 = vpow2.f32 %v2116_v1 }
0x2314   :  { %v2262_v14 = vpop.eup %2261 }
0x2315   :  { %1806 = vrot.lane.b32.xlu2 %v2262_v14, %s2355_s5 }
0x2316   :  { %v2264_v38 = vpop.eup %2263 }
0x2317   :  { %v1787_v31 = vadd.f32 1.0, %v2264_v38 }
0x2319   :  { %2265 = vrcp.f32 %v1787_v31  ;;  %v1799_v43 = vand.u32 2147483648, %v1787_v31  ;;  %vm1793_vm2 = vweird.f32 %v1787_v31  ;;  %v1797_v13 = vand.u32 2147483647, %v1787_v31 }
0x231b   :  { %v1800_v47 = vor.u32 1.1754944e-38, %v1799_v43  ;;  %vm1798_vm4 = vcmp.eq.f32.partialorder %v1797_v13, 8.507059e+37  ;;  %v1938_v43 = vld [vmem:[%s1937_s29] sm:$0xff] }
0x231c   :  { %v1906_v13 = vld [vmem:[%s3115_s10] sm:$0x1]  ;;  %s1942_s10 = scalar_lea.vmem %s3117_s12, %s3080_s8 }
0x231d   :  { %1830 = vrot.lane.b32.xlu2 %v1829_v24, %s2355_s5 }
0x231f   :  { %v2266_v35 = vpop.eup %2265 }
0x2320   :  { %v1789_v18 = vmul.f32 %v2266_v35, %v1787_v31  ;;  %vm1794_vm15 = vweird.f32 %v2266_v35  ;;  %v2001_v31 = vld [vmem:[%s3052_s23 + $0x10] sm:$0xff] }
0x2321   :  { %vm1795_vm3 = vmor %vm1793_vm2, %vm1794_vm15  ;;  %2021 = vmatpush.msra.mxu1 %v2001_v31 }
0x2322   :  { %v1790_v37 = vsub.f32 1.0, %v1789_v18  ;;  %v1941_v18 = vld [vmem:[%s1937_s29 + $0x18] sm:$0xff] }
0x2323   :  { %1959 = vmatpush.msrb.mxu3 %v1941_v18 }
0x2324   :  { %v1791_v41 = vmul.f32 %v2266_v35, %v1790_v37  ;;  %v1999_v37 = vld [vmem:[%s3052_s23] sm:$0xff] }
0x2325   :  { %1860 = vrot.lane.b32.xlu2 %v1859_v27, %s2355_s5 }
0x2326   :  { %v1792_v42 = vadd.f32 %v2266_v35, %v1791_v41  ;;  %v1940_v41 = vld [vmem:[%s1937_s29 + $0x10] sm:$0xff] }
0x2327   :  { %1960 = vmatpush.msrb.mxu3 %v1940_v41 }
0x2328   :  { %v1796_v25 = vsel %vm1795_vm3, %v2266_v35, %v1792_v42  ;;  %v2000_v35 = vld [vmem:[%s3052_s23 + $0x8] sm:$0xff] }
0x2329   :  { %v1801_v50 = vsel %vm1798_vm4, %v1800_v47, %v1796_v25  ;;  %2022 = vmatpush.msra.mxu1 %v2000_v35  ;;  %v1939_v42 = vld [vmem:[%s1937_s29 + $0x8] sm:$0xff] }
0x232a   :  { %v1804_v3 = vmul.f32 %v1801_v50, %v1717_v33  ;;  %1961 = vmatpush.msrb.mxu3 %v1939_v42 }
0x232b   :  { %2023 = vmatpush.msra.mxu1 %v1999_v37 }
0x232c   :  { %1962 = vmatpush.msrb.mxu3 %v1938_v43 }
0x232d   :  { %1848 = vrot.lane.b32.xlu2 %v1847_v30, %s2355_s5 }
0x236f   :  { %v1807_v32 = vpop.permute.xlu2 %1806 }
0x2370   :  { %v1809_v51 = vmul.f32 %v1807_v32, %v1801_v50 }
0x2372   :  { %1811 = vrot.lane.b32.xlu0 %v1809_v51, %s2356_s18 }
0x2377   :  { %v1831_v62 = vpop.permute.xlu2 %1830 }
0x2378   :  { %v1833_v33 = vsel %vm110_vm0, %v2898_v17, %v1831_v62 }
0x2379   :  { %v1873_v4 = vrot.slane %v1833_v33, 6 }
0x237a   :  { %1854 = vrot.lane.b32.xlu0 %v1853_v23, %s2355_s5 }
0x237f   :  { %v1861_v15 = vpop.permute.xlu2 %1860 }
0x2387   :  { %v1849_v58 = vpop.permute.xlu2 %1848 }
0x23e4   :  { %v1812_v40 = vpop.permute.xlu0 %1811 }
0x23e5   :  { %v1814_v9 = vadd.f32 %v1812_v40, %v1804_v3  ;;  %v2004_v3 = vld [vmem:[%s2003_s14] sm:$0x1] }
0x23e7   :  { %2267 = vtanh.f32 %v1814_v9 }
0x23ec   :  { %v1855_v28 = vpop.permute.xlu0 %1854 }
0x23ed   :  { %v2268_v45 = vpop.eup %2267  ;;  %v1857_v53 = vsel %vm110_vm0, %v2982_v22, %v1855_v28  ;;  %v1851_v22 = vsel %vm110_vm0, %v2966_v16, %v1849_v58 }
0x23ee   :  { %1817 = vrot.lane.b32.xlu1 %v2268_v45, %s2355_s5  ;;  %v1882_v20 = vrot.slane %v1857_v53, 6  ;;  %v1943_v45 = vld [vmem:[%s1942_s10] sm:$0x1] }
0x23f6   :  { %1836 = vrot.lane.b32.xlu1 %v1835_v52, %s2355_s5 }
0x23fe   :  { %1842 = vrot.lane.b32.xlu1 %v1841_v59, %s2355_s5 }
0x2406   :  { %1868 = vrot.lane.b32.xlu1 %v1867_v55, %s2355_s5 }
0x2460   :  { %v1818_v29 = vpop.permute.xlu1 %1817 }
0x2461   :  { %v1820_v11 = vmul.f32 %v1818_v29, %v1801_v50 }
0x2463   :  { %v1823_v56 = vrot.slane %v1820_v11, 2 }
0x2465   :  { %1824 = vrot.lane.b32.xlu0 %v1823_v56, %s2355_s5 }
0x2468   :  { %v1837_v10 = vpop.permute.xlu1 %1836 }
0x2469   :  { %v1839_v36 = vsel %vm110_vm0, %v2922_v57, %v1837_v10 }
0x246a   :  { %v1876_v8 = vrot.slane %v1839_v36, 4 }
0x246d   :  { %1864 = vrot.lane.b32.xlu0 %v1820_v11, %s2356_s18 }
0x2470   :  { %v1843_v26 = vpop.permute.xlu1 %1842 }
0x2471   :  { %v1845_v2 = vsel %vm110_vm0, %v2946_v34, %v1843_v26  ;;  %v1863_v34 = vsel %vm110_vm0, %v2995_v5, %v1861_v15 }
0x2472   :  { %v1879_v39 = vrot.slane %v1845_v2, 2  ;;  %v1885_v24 = vrot.slane %v1863_v34, 4 }
0x2478   :  { %v1869_v21 = vpop.permute.xlu1 %1868 }
0x24d7   :  { %v1825_v6 = vpop.permute.xlu0 %1824 }
0x24d8   :  { %v1827_v12 = vsel %vm110_vm0, %v2874_v49, %v1825_v6  ;;  %v1893_v49 = vsel %vm214_vm1, %v1851_v22, %v1882_v20 }
0x24d9   :  { %v1890_v19 = vsel %vm214_vm1, %v1827_v12, %v1873_v4  ;;  %v1894_v1 = vsel %vm984_vm7, %v1893_v49, %v1885_v24  ;;  %vm2033_vm1 = vcmask 123904  }
0x24da   :  { %v1891_v17 = vsel %vm984_vm7, %v1890_v19, %v1876_v8 }
0x24db   :  { %v1892_v57 = vsel %vm986_vm6, %v1891_v17, %v1879_v39 }
0x24dc   :  { %1896 = vst.msk [vmem:[#allocation2] sm:$0xff] %vm1021_vm8, %v1892_v57 }
0x24df   :  { %v1865_v14 = vpop.permute.xlu0 %1864 }
0x24e0   :  { %v1871_v27 = vsel %vm110_vm0, %v1865_v14, %v1869_v21 }
0x24e1   :  { %v1888_v30 = vrot.slane %v1871_v27, 2 }
0x24e3   :  { %v1895_v38 = vsel %vm986_vm6, %v1894_v1, %v1888_v30 }
0x24e4   :  { %1897 = vst.msk [vmem:[#allocation2 + $0x8] sm:$0xff] %vm1021_vm8, %v1895_v38 }
0x24eb   :  { %v1910_v16 = vld [vmem:[%s1909_s6] sm:$0x1]  ;;  %v2123_v5 = vld [vmem:[%s2060_s3 + $0x1] sm:$0x1] }
0x24ec   :  { %2118 = vmatmul.msk.f32.vlgmr.msra.gmra.mxu2 %vm1021_vm8, %v1910_v16  ;;  %2124 = vmatmul.msk.f32.vlgmr.msra.gmra.mxu0 %vm1021_vm8, %v2123_v5 }
0x2569   :  { %v1992_v25 = vpop.f32.mrf.mxu0 }
0x256a   :  { %v1993_v47 = vadd.f32 %v1992_v25, %v1906_v13 }
0x256c   :  { %v1995_v32 = vmax.f32 %v1993_v47, 0.0 }
0x256e   :  { %2127 = vmatmul.msk.f32.vlgmr.msra.gmra.mxu1 %vm110_vm0, %v1995_v32 }
0x256f   :  { %v1931_v50 = vpop.f32.mrf.mxu2 }
0x2570   :  { %v1932_v51 = vadd.f32 %v1931_v50, %v1906_v13 }
0x2572   :  { %v1934_v23 = vmax.f32 %v1932_v51, 0.0 }
0x2574   :  { %2120 = vmatmul.msk.f32.vlgmr.msrb.gmra.mxu3 %vm110_vm0, %v1934_v23  ;;  %vm2031_vm0 = vcmask 1040384  }
0x25eb   :  { %v2025_v40 = vpop.f32.mrf.mxu1 }
0x25ec   :  { %v2026_v9 = vadd.f32 %v2025_v40, %v2004_v3 }
0x25ee   :  { %v2029_v59 = vrot.slane %v2026_v9, 7 }
0x25f7   :  { %v1964_v52 = vpop.f32.mrf.mxu3 }
0x25f8   :  { %v1965_v55 = vadd.f32 %v1964_v52, %v1943_v45 }
0x25fa   :  { %v2032_v29 = vsel %vm2031_vm0, %v1965_v55, %v2029_v59 }
0x25fb   :  { %2034 = vst.msk [vmem:[#allocation10] sm:$0x3] %vm2033_vm1, %v2032_v29 }
0x25fc   :  { %2045 = dma.vmem_to_hbm [thread:$0]  %s2041_s17, 32, %s2043_s21, [#allocation5]  }
0x25fd   :  { %2347 = dma.done.wait [#allocation5], 32  }
0x25fe   :  { %2348 = vsyncadd [#allocation5], 4294967264 }
0x25ff   :  { %2050 = vsyncpa [#allocation4], 1 }
0x2600   :  { %2051 = vsyncpa [#allocation5], 1 }
0x2601   :  { %2052 = vsyncpa [#allocation6], 1 }
0x2602   :  { %2053 = vsyncpa [#allocation8], 1 }

</bundles_post_ra>
